<compile_context>
chip_gen: v7x
topology: tpu7x:2x2x1
jax: 0.10.0
libtpu: 0.0.40
codegen_flags: <defaults>
</compile_context>

<pallas_src>
import functools

import jax
import jax.numpy as jnp
from jax import lax
from jax.experimental import pallas as pl
from jax.experimental.pallas import tpu as pltpu


# ----------------------------------------------------------------------------
# Fused (LN?) -> matmul -> +bias -> (QuickGELU?) -> (+residual?) kernel
# ----------------------------------------------------------------------------
def _fused_linear_kernel(*refs, activation, eps, has_ln, has_residual):
    x_ref, w_ref, b_ref = refs[0], refs[1], refs[2]
    idx = 3
    if has_ln:
        g_ref, bt_ref = refs[idx], refs[idx + 1]
        idx += 2
    if has_residual:
        r_ref = refs[idx]
        idx += 1
    o_ref = refs[idx]

    # LayerNorm prologue in f32 over the full feature (K) dim.
    x = x_ref[...].astype(jnp.float32)
    if has_ln:
        mu = jnp.mean(x, axis=-1, keepdims=True)
        xc = x - mu
        var = jnp.mean(xc * xc, axis=-1, keepdims=True)
        x = xc * lax.rsqrt(var + eps) * g_ref[...] + bt_ref[...]

    # bf16 MXU matmul, f32 accumulation.
    y = jnp.dot(x.astype(jnp.bfloat16), w_ref[...],
                preferred_element_type=jnp.float32)
    y = y + b_ref[...]

    if activation == "quick_gelu":
        # CLIP QuickGELU: y * sigmoid(1.702 * y), in f32 (EUP path).
        y = y * jax.nn.sigmoid(1.702 * y)

    if has_residual:
        y = y + r_ref[...].astype(jnp.float32)

    o_ref[...] = y


def fused_linear(x, w, b, *, ln_gamma=None, ln_beta=None, residual=None,
                 activation=None, eps=1e-5, tm=256, tn=512):
    """y = [LN(x)] @ w + b, optional QuickGELU, optional +residual.

    x: (M, K) f32, w: (K, N) bf16 (pre-transposed / pre-cast), b: (N,) f32.
    Tiled over (M, N); K kept whole (<= a few K for CLIP-scale widths).
    TM=256 / TN=512 keep the double-buffered footprint far below the 32 MiB
    scoped-VMEM default; small M / N fall back to full-dim blocks.
    """
    M, K = x.shape
    Kw, N = w.shape
    assert Kw == K

    TM = M if M <= tm else tm          # tm is a multiple of 8
    TN = N if N <= tn else tn          # tn is a multiple of 128
    grid = (pl.cdiv(M, TM), pl.cdiv(N, TN))

    has_ln = ln_gamma is not None
    has_res = residual is not None

    in_specs = [
        pl.BlockSpec((TM, K), lambda i, j: (i, 0)),
        pl.BlockSpec((K, TN), lambda i, j: (0, j)),
        pl.BlockSpec((1, TN), lambda i, j: (0, j)),
    ]
    args = [x, w.astype(jnp.bfloat16), b.reshape(1, N).astype(jnp.float32)]

    if has_ln:
        in_specs += [pl.BlockSpec((1, K), lambda i, j: (0, 0)),
                     pl.BlockSpec((1, K), lambda i, j: (0, 0))]
        args += [ln_gamma.reshape(1, K).astype(jnp.float32),
                 ln_beta.reshape(1, K).astype(jnp.float32)]
    if has_res:
        in_specs += [pl.BlockSpec((TM, TN), lambda i, j: (i, j))]
        args += [residual]

    flops = 2 * M * N * K
    transcendentals = M * N if activation == "quick_gelu" else 0
    bytes_accessed = M * K * 4 + K * N * 2 + N * 4 + M * N * 4
    if has_res:
        bytes_accessed += M * N * 4
    if has_ln:
        bytes_accessed += 2 * K * 4

    return pl.pallas_call(
        functools.partial(_fused_linear_kernel, activation=activation, eps=eps,
                          has_ln=has_ln, has_residual=has_res),
        out_shape=jax.ShapeDtypeStruct((M, N), jnp.float32),
        grid=grid,
        in_specs=in_specs,
        out_specs=pl.BlockSpec((TM, TN), lambda i, j: (i, j)),
        compiler_params=pltpu.CompilerParams(
            dimension_semantics=("parallel", "parallel")),
        cost_estimate=pl.CostEstimate(flops=flops,
                                      transcendentals=transcendentals,
                                      bytes_accessed=bytes_accessed),
    )(*args)


# ----------------------------------------------------------------------------
# Standalone tiled LayerNorm (only used for ln_pre, which feeds the residual
# stream and therefore cannot be fused into a following matmul).
# ----------------------------------------------------------------------------
def _layernorm_kernel(x_ref, g_ref, b_ref, o_ref, *, eps):
    x = x_ref[...].astype(jnp.float32)
    mu = jnp.mean(x, axis=-1, keepdims=True)
    xc = x - mu
    var = jnp.mean(xc * xc, axis=-1, keepdims=True)
    o_ref[...] = xc * lax.rsqrt(var + eps) * g_ref[...] + b_ref[...]


def pallas_layernorm(x, gamma, beta, eps=1e-5, tm=512):
    M, D = x.shape
    TM = M if M <= tm else tm
    return pl.pallas_call(
        functools.partial(_layernorm_kernel, eps=eps),
        out_shape=jax.ShapeDtypeStruct((M, D), jnp.float32),
        grid=(pl.cdiv(M, TM),),
        in_specs=[
            pl.BlockSpec((TM, D), lambda i: (i, 0)),
            pl.BlockSpec((1, D), lambda i: (0, 0)),
            pl.BlockSpec((1, D), lambda i: (0, 0)),
        ],
        out_specs=pl.BlockSpec((TM, D), lambda i: (i, 0)),
        compiler_params=pltpu.CompilerParams(
            dimension_semantics=("parallel",)),
    )(x, gamma.reshape(1, D).astype(jnp.float32),
      beta.reshape(1, D).astype(jnp.float32))


# ----------------------------------------------------------------------------
# Multi-head self-attention: one grid step per batch element, all heads inside
# the kernel, reading the raw (S, 3*width) QKV slab and writing a lane-dense
# (S, width) output slab.
# ----------------------------------------------------------------------------
def _mha_kernel(qkv_ref, o_ref, *, heads, dh, scale):
    width = heads * dh
    qkv = qkv_ref[0].astype(jnp.float32)          # (S, 3*width)
    outs = []
    for h in range(heads):
        # torch MultiheadAttention in_proj layout: [Q | K | V] along features;
        # head h occupies columns h*dh:(h+1)*dh of its section.
        q = qkv[:, h * dh:(h + 1) * dh] * scale   # pre-scale q (cheaper than SxS)
        k = qkv[:, width + h * dh: width + (h + 1) * dh]
        v = qkv[:, 2 * width + h * dh: 2 * width + (h + 1) * dh]

        # q @ k^T via dot_general dimension numbers (no materialized transpose).
        s = lax.dot_general(q.astype(jnp.bfloat16), k.astype(jnp.bfloat16),
                            dimension_numbers=(((1,), (1,)), ((), ())),
                            preferred_element_type=jnp.float32)
        s = s - jnp.max(s, axis=-1, keepdims=True)
        p = jnp.exp(s)
        denom = jnp.sum(p, axis=-1, keepdims=True)
        p = p * pl.reciprocal(denom, approx=True)  # EUP divide (denom >= 1, safe)
        outs.append(jnp.dot(p.astype(jnp.bfloat16), v.astype(jnp.bfloat16),
                            preferred_element_type=jnp.float32))
    # Single lane-dense store of the full width (no per-head partial stores).
    o_ref[0] = jnp.concatenate(outs, axis=-1)


def pallas_attention(qkv, *, heads):
    """qkv: (B, S, 3*width) f32 -> (B, S, width) f32 (heads concatenated)."""
    B, S, W3 = qkv.shape
    width = W3 // 3
    dh = width // heads
    scale = 1.0 / float(dh) ** 0.5

    flops = 4 * B * S * S * width
    transcendentals = B * heads * S * S
    bytes_accessed = B * S * W3 * 4 + B * S * width * 4

    return pl.pallas_call(
        functools.partial(_mha_kernel, heads=heads, dh=dh, scale=scale),
        out_shape=jax.ShapeDtypeStruct((B, S, width), jnp.float32),
        grid=(B,),
        in_specs=[pl.BlockSpec((1, S, W3), lambda b: (b, 0, 0))],
        out_specs=pl.BlockSpec((1, S, width), lambda b: (b, 0, 0)),
        compiler_params=pltpu.CompilerParams(
            dimension_semantics=("parallel",)),
        cost_estimate=pl.CostEstimate(flops=flops,
                                      transcendentals=transcendentals,
                                      bytes_accessed=bytes_accessed),
    )(qkv)


# ----------------------------------------------------------------------------
# Parameter construction (deterministic, synthetic) -- fp32 masters matching
# ImageCLIP.convert_to_fp32(); then a one-time prepare step transposes and
# casts matmul weights to bf16 for the TPU kernels.
# ----------------------------------------------------------------------------
def init_params(key, *, in_ch=3, image_size=16, patch=4, width=32,
                layers=2, heads=4, output_dim=32):
    n_patches = (image_size // patch) ** 2
    keys = iter(jax.random.split(key, 8 + 12 * layers))

    def nrm(shape, std=0.02):
        return (std * jax.random.normal(next(keys), shape)).astype(jnp.float32)

    params = {
        "conv_w": nrm((width, in_ch, patch, patch)),          # conv1, bias=False
        "class_emb": nrm((width,)),
        "pos_emb": nrm((n_patches + 1, width)),
        "ln_pre_g": jnp.ones((width,), jnp.float32),
        "ln_pre_b": jnp.zeros((width,), jnp.float32),
        "ln_post_g": jnp.ones((width,), jnp.float32),
        "ln_post_b": jnp.zeros((width,), jnp.float32),
        "proj": nrm((width, output_dim)),
        "layers": [],
    }
    for _ in range(layers):
        params["layers"].append({
            "ln1_g": jnp.ones((width,), jnp.float32),
            "ln1_b": jnp.zeros((width,), jnp.float32),
            "in_w": nrm((3 * width, width)),      # torch MultiheadAttention in_proj
            "in_b": jnp.zeros((3 * width,), jnp.float32),
            "out_w": nrm((width, width)),         # out_proj (torch Linear: (out, in))
            "out_b": jnp.zeros((width,), jnp.float32),
            "ln2_g": jnp.ones((width,), jnp.float32),
            "ln2_b": jnp.zeros((width,), jnp.float32),
            "fc_w": nrm((4 * width, width)),      # mlp c_fc
            "fc_b": jnp.zeros((4 * width,), jnp.float32),
            "proj_w": nrm((width, 4 * width)),    # mlp c_proj
            "proj_b": jnp.zeros((width,), jnp.float32),
        })
    return params


def prepare_for_tpu(params, *, patch):
    """One-time weight prep: transpose to (K, N) layout and cast to bf16."""
    width = params["class_emb"].shape[0]
    in_ch = params["conv_w"].shape[1]
    prepped = {
        "conv_w": params["conv_w"].reshape(width, in_ch * patch * patch)
                                   .T.astype(jnp.bfloat16),     # (C*p*p, width)
        "class_emb": params["class_emb"],
        "pos_emb": params["pos_emb"],
        "ln_pre_g": params["ln_pre_g"], "ln_pre_b": params["ln_pre_b"],
        "ln_post_g": params["ln_post_g"], "ln_post_b": params["ln_post_b"],
        "proj": params["proj"].astype(jnp.bfloat16),             # (width, out_dim)
        "layers": [],
    }
    for layer in params["layers"]:
        prepped["layers"].append({
            "ln1_g": layer["ln1_g"], "ln1_b": layer["ln1_b"],
            "in_w": layer["in_w"].T.astype(jnp.bfloat16),        # (width, 3*width)
            "in_b": layer["in_b"],
            "out_w": layer["out_w"].T.astype(jnp.bfloat16),      # (width, width)
            "out_b": layer["out_b"],
            "ln2_g": layer["ln2_g"], "ln2_b": layer["ln2_b"],
            "fc_w": layer["fc_w"].T.astype(jnp.bfloat16),        # (width, 4*width)
            "fc_b": layer["fc_b"],
            "proj_w": layer["proj_w"].T.astype(jnp.bfloat16),    # (4*width, width)
            "proj_b": layer["proj_b"],
        })
    return prepped


# ----------------------------------------------------------------------------
# Forward: CLIP encode_image (== ImageCLIP.forward)
# ----------------------------------------------------------------------------
def encode_image(params, image, *, patch=4, heads=4):
    B, C, H, W = image.shape
    width = params["class_emb"].shape[0]
    out_dim = params["proj"].shape[1]
    gh, gw = H // patch, W // patch

    zeros_w = jnp.zeros((width,), jnp.float32)
    zeros_o = jnp.zeros((out_dim,), jnp.float32)

    # Patch-embedding conv (stride = kernel = patch, no bias) as a matmul.
    x = image.reshape(B, C, gh, patch, gw, patch)
    x = x.transpose(0, 2, 4, 1, 3, 5).reshape(B * gh * gw, C * patch * patch)
    x = fused_linear(x, params["conv_w"], zeros_w)
    x = x.reshape(B, gh * gw, width)

    # Prepend class token, add positional embedding (host-side glue).
    cls = jnp.broadcast_to(params["class_emb"].reshape(1, 1, width), (B, 1, width))
    x = jnp.concatenate([cls, x], axis=1)
    x = x + params["pos_emb"][None, :, :]
    S = x.shape[1]

    # ln_pre (its output *is* the residual stream, so it stays standalone).
    x2 = pallas_layernorm(x.reshape(B * S, width),
                          params["ln_pre_g"], params["ln_pre_b"])

    # Transformer residual blocks (x2 is the flat (B*S, width) residual stream).
    for layer in params["layers"]:
        # --- multi-head self-attention: LN1 fused into the QKV projection ---
        qkv = fused_linear(x2, layer["in_w"], layer["in_b"],
                           ln_gamma=layer["ln1_g"], ln_beta=layer["ln1_b"])
        qkv = qkv.reshape(B, S, 3 * width)
        attn = pallas_attention(qkv, heads=heads).reshape(B * S, width)
        # out-proj with residual add fused into the epilogue.
        x2 = fused_linear(attn, layer["out_w"], layer["out_b"], residual=x2)

        # --- MLP: LN2 + QuickGELU fused into c_fc; residual fused into c_proj ---
        h = fused_linear(x2, layer["fc_w"], layer["fc_b"],
                         ln_gamma=layer["ln2_g"], ln_beta=layer["ln2_b"],
                         activation="quick_gelu")
        x2 = fused_linear(h, layer["proj_w"], layer["proj_b"], residual=x2)

    # Class token -> ln_post -> projection (LN fused into the projection).
    cls_tok = x2.reshape(B, S, width)[:, 0, :]
    out = fused_linear(cls_tok, params["proj"], zeros_o,
                       ln_gamma=params["ln_post_g"], ln_beta=params["ln_post_b"])
    return out


if __name__ == "__main__":
    key = jax.random.PRNGKey(0)
    k_img, k_par = jax.random.split(key)

    B, C, H, W = 2, 3, 16, 16          # small synthetic "image"
    image = jax.random.normal(k_img, (B, C, H, W), dtype=jnp.float32)
    params = init_params(k_par, in_ch=C, image_size=H, patch=4,
                         width=32, layers=2, heads=4, output_dim=32)
    prepped = prepare_for_tpu(params, patch=4)

    fwd = jax.jit(functools.partial(encode_image, patch=4, heads=4))
    out = fwd(prepped, image)
    out = jax.block_until_ready(out)
    assert out.shape == (B, 32) and out.dtype == jnp.float32
    assert bool(jnp.all(jnp.isfinite(out)))
    print("KERNEL_OK")
</pallas_src>

<mosaic_0001>
module attributes {stable_mosaic.version = 11 : i64} {
  func.func @_layernorm_kernel(%arg0: i32, %arg1: memref<34x32xf32, #tpu.memory_space<vmem>>, %arg2: memref<1x32xf32, #tpu.memory_space<vmem>>, %arg3: memref<1x32xf32, #tpu.memory_space<vmem>>, %arg4: memref<34x32xf32, #tpu.memory_space<vmem>>) attributes {dimension_semantics = [#tpu.dimension_semantics<parallel>], iteration_bounds = array<i64: 1>, scalar_prefetch = 0 : i64, scratch_operands = 0 : i64, tpu.core_type = #tpu.core_type<tc>, window_params = [{transform_indices = @transform_0, window_bounds = array<i64: 34, 32>}, {pipeline_mode = #tpu.pipeline_mode<synchronous>, transform_indices = @transform_1, window_bounds = array<i64: 1, 32>}, {pipeline_mode = #tpu.pipeline_mode<synchronous>, transform_indices = @transform_2, window_bounds = array<i64: 1, 32>}, {transform_indices = @transform_3, window_bounds = array<i64: 34, 32>}]} {
    %c0 = arith.constant 0 : index
    %c0_0 = arith.constant 0 : index
    %0 = vector.load %arg1[%c0, %c0_0] : memref<34x32xf32, #tpu.memory_space<vmem>>, vector<34x32xf32>
    %cst = arith.constant dense<0.000000e+00> : vector<34xf32>
    %1 = vector.multi_reduction <add>, %0, %cst [1] : vector<34x32xf32> to vector<34xf32>
    %2 = vector.shape_cast %1 : vector<34xf32> to vector<34x1xf32>
    %cst_1 = arith.constant 3.200000e+01 : f32
    %3 = vector.broadcast %cst_1 : f32 to vector<34x1xf32>
    %4 = arith.divf %2, %3 : vector<34x1xf32>
    %5 = vector.broadcast %4 : vector<34x1xf32> to vector<34x32xf32>
    %6 = arith.subf %0, %5 : vector<34x32xf32>
    %7 = arith.mulf %6, %6 : vector<34x32xf32>
    %cst_2 = arith.constant dense<0.000000e+00> : vector<34xf32>
    %8 = vector.multi_reduction <add>, %7, %cst_2 [1] : vector<34x32xf32> to vector<34xf32>
    %9 = vector.shape_cast %8 : vector<34xf32> to vector<34x1xf32>
    %cst_3 = arith.constant 3.200000e+01 : f32
    %10 = vector.broadcast %cst_3 : f32 to vector<34x1xf32>
    %11 = arith.divf %9, %10 : vector<34x1xf32>
    %cst_4 = arith.constant 9.99999974E-6 : f32
    %12 = vector.broadcast %cst_4 : f32 to vector<34x1xf32>
    %13 = arith.addf %11, %12 : vector<34x1xf32>
    %14 = math.rsqrt %13 : vector<34x1xf32>
    %15 = vector.broadcast %14 : vector<34x1xf32> to vector<34x32xf32>
    %16 = arith.mulf %6, %15 : vector<34x32xf32>
    %c0_5 = arith.constant 0 : index
    %c0_6 = arith.constant 0 : index
    %17 = vector.load %arg2[%c0_5, %c0_6] : memref<1x32xf32, #tpu.memory_space<vmem>>, vector<1x32xf32>
    %18 = vector.broadcast %17 : vector<1x32xf32> to vector<34x32xf32>
    %19 = arith.mulf %16, %18 : vector<34x32xf32>
    %c0_7 = arith.constant 0 : index
    %c0_8 = arith.constant 0 : index
    %20 = vector.load %arg3[%c0_7, %c0_8] : memref<1x32xf32, #tpu.memory_space<vmem>>, vector<1x32xf32>
    %21 = vector.broadcast %20 : vector<1x32xf32> to vector<34x32xf32>
    %22 = arith.addf %19, %21 : vector<34x32xf32>
    %c0_9 = arith.constant 0 : index
    %c0_10 = arith.constant 0 : index
    %23 = vector.load %arg4[%c0_9, %c0_10] : memref<34x32xf32, #tpu.memory_space<vmem>>, vector<34x32xf32>
    tpu.vector_store %arg4[%c0_9, %c0_10], %22 {strides = array<i32>} : memref<34x32xf32, #tpu.memory_space<vmem>>, vector<34x32xf32>,
    return
  }
  func.func @transform_0(%arg0: i32) -> (i32, i32) {
    %c0_i32 = arith.constant 0 : i32
    %c0_i32_0 = arith.constant 0 : i32
    return %arg0, %c0_i32 : i32, i32
  }
  func.func @transform_1(%arg0: i32) -> (i32, i32) {
    %c0_i32 = arith.constant 0 : i32
    %c0_i32_0 = arith.constant 0 : i32
    %c0_i32_1 = arith.constant 0 : i32
    return %c0_i32, %c0_i32_0 : i32, i32
  }
  func.func @transform_2(%arg0: i32) -> (i32, i32) {
    %c0_i32 = arith.constant 0 : i32
    %c0_i32_0 = arith.constant 0 : i32
    %c0_i32_1 = arith.constant 0 : i32
    return %c0_i32, %c0_i32_0 : i32, i32
  }
  func.func @transform_3(%arg0: i32) -> (i32, i32) {
    %c0_i32 = arith.constant 0 : i32
    %c0_i32_0 = arith.constant 0 : i32
    return %arg0, %c0_i32 : i32, i32
  }
}

module attributes {stable_mosaic.version = 11 : i64} {
  func.func @_fused_linear_kernel(%arg0: i32, %arg1: i32, %arg2: memref<32x48xf32, #tpu.memory_space<vmem>>, %arg3: memref<48x32xbf16, #tpu.memory_space<vmem>>, %arg4: memref<1x32xf32, #tpu.memory_space<vmem>>, %arg5: memref<32x32xf32, #tpu.memory_space<vmem>>) attributes {dimension_semantics = [#tpu.dimension_semantics<parallel>, #tpu.dimension_semantics<parallel>], iteration_bounds = array<i64: 1, 1>, scalar_prefetch = 0 : i64, scratch_operands = 0 : i64, tpu.core_type = #tpu.core_type<tc>, window_params = [{transform_indices = @transform_0, window_bounds = array<i64: 32, 48>}, {transform_indices = @transform_1, window_bounds = array<i64: 48, 32>}, {transform_indices = @transform_2, window_bounds = array<i64: 1, 32>}, {transform_indices = @transform_3, window_bounds = array<i64: 32, 32>}]} {
    %c0 = arith.constant 0 : index
    %c0_0 = arith.constant 0 : index
    %0 = vector.load %arg2[%c0, %c0_0] : memref<32x48xf32, #tpu.memory_space<vmem>>, vector<32x48xf32>
    %1 = arith.truncf %0 : vector<32x48xf32> to vector<32x48xbf16>
    %c0_1 = arith.constant 0 : index
    %c0_2 = arith.constant 0 : index
    %2 = vector.load %arg3[%c0_1, %c0_2] : memref<48x32xbf16, #tpu.memory_space<vmem>>, vector<48x32xbf16>
    %cst = arith.constant dense<0.000000e+00> : vector<32x32xf32>
    %3 = tpu.matmul %1, %2, %cst {dimension_numbers = #tpu.dot_dimension_numbers<[1], [0], [0], [1], [0, 0, 1, 1], [], []>} : vector<32x48xbf16>, vector<48x32xbf16>, vector<32x32xf32> -> vector<32x32xf32>
    %c0_3 = arith.constant 0 : index
    %c0_4 = arith.constant 0 : index
    %4 = vector.load %arg4[%c0_3, %c0_4] : memref<1x32xf32, #tpu.memory_space<vmem>>, vector<1x32xf32>
    %5 = vector.broadcast %4 : vector<1x32xf32> to vector<32x32xf32>
    %6 = arith.addf %3, %5 : vector<32x32xf32>
    %c0_5 = arith.constant 0 : index
    %c0_6 = arith.constant 0 : index
    %7 = vector.load %arg5[%c0_5, %c0_6] : memref<32x32xf32, #tpu.memory_space<vmem>>, vector<32x32xf32>
    tpu.vector_store %arg5[%c0_5, %c0_6], %6 {strides = array<i32>} : memref<32x32xf32, #tpu.memory_space<vmem>>, vector<32x32xf32>,
    return
  }
  func.func @transform_0(%arg0: i32, %arg1: i32) -> (i32, i32) {
    %c0_i32 = arith.constant 0 : i32
    %c0_i32_0 = arith.constant 0 : i32
    return %arg0, %c0_i32 : i32, i32
  }
  func.func @transform_1(%arg0: i32, %arg1: i32) -> (i32, i32) {
    %c0_i32 = arith.constant 0 : i32
    %c0_i32_0 = arith.constant 0 : i32
    return %c0_i32, %arg1 : i32, i32
  }
  func.func @transform_2(%arg0: i32, %arg1: i32) -> (i32, i32) {
    %c0_i32 = arith.constant 0 : i32
    %c0_i32_0 = arith.constant 0 : i32
    return %c0_i32, %arg1 : i32, i32
  }
  func.func @transform_3(%arg0: i32, %arg1: i32) -> (i32, i32) {
    %c0_i32 = arith.constant 0 : i32
    return %arg0, %arg1 : i32, i32
  }
}

module attributes {stable_mosaic.version = 11 : i64} {
  func.func @_mha_kernel(%arg0: i32, %arg1: memref<1x17x96xf32, #tpu.memory_space<vmem>>, %arg2: memref<1x17x32xf32, #tpu.memory_space<vmem>>) attributes {dimension_semantics = [#tpu.dimension_semantics<parallel>], iteration_bounds = array<i64: 2>, scalar_prefetch = 0 : i64, scratch_operands = 0 : i64, tpu.core_type = #tpu.core_type<tc>, window_params = [{transform_indices = @transform_0, window_bounds = array<i64: 1, 17, 96>}, {transform_indices = @transform_1, window_bounds = array<i64: 1, 17, 32>}]} {
    %c0 = arith.constant 0 : index
    %c0_0 = arith.constant 0 : index
    %c0_1 = arith.constant 0 : index
    %0 = vector.load %arg1[%c0, %c0_0, %c0_1] : memref<1x17x96xf32, #tpu.memory_space<vmem>>, vector<1x17x96xf32>
    %1 = vector.shape_cast %0 : vector<1x17x96xf32> to vector<17x96xf32>
    %2 = vector.extract_strided_slice %1 {offsets = [0, 0], sizes = [17, 8], strides = [1, 1]} : vector<17x96xf32> to vector<17x8xf32>
    %cst = arith.constant 0.353553385 : f32
    %3 = vector.broadcast %cst : f32 to vector<17x8xf32>
    %4 = arith.mulf %2, %3 : vector<17x8xf32>
    %5 = vector.extract_strided_slice %1 {offsets = [0, 32], sizes = [17, 8], strides = [1, 1]} : vector<17x96xf32> to vector<17x8xf32>
    %6 = vector.extract_strided_slice %1 {offsets = [0, 64], sizes = [17, 8], strides = [1, 1]} : vector<17x96xf32> to vector<17x8xf32>
    %7 = arith.truncf %4 : vector<17x8xf32> to vector<17x8xbf16>
    %8 = arith.truncf %5 : vector<17x8xf32> to vector<17x8xbf16>
    %cst_2 = arith.constant dense<0.000000e+00> : vector<17x17xf32>
    %9 = tpu.matmul %7, %8, %cst_2 {dimension_numbers = #tpu.dot_dimension_numbers<[1], [1], [0], [0], [0, 0, 1, 0], [], []>} : vector<17x8xbf16>, vector<17x8xbf16>, vector<17x17xf32> -> vector<17x17xf32>
    %cst_3 = arith.constant dense<0xFF800000> : vector<17xf32>
    %10 = vector.multi_reduction <maximumf>, %9, %cst_3 [1] : vector<17x17xf32> to vector<17xf32>
    %11 = vector.shape_cast %10 : vector<17xf32> to vector<17x1xf32>
    %12 = vector.broadcast %11 : vector<17x1xf32> to vector<17x17xf32>
    %13 = arith.subf %9, %12 : vector<17x17xf32>
    %14 = math.exp %13 : vector<17x17xf32>
    %cst_4 = arith.constant dense<0.000000e+00> : vector<17xf32>
    %15 = vector.multi_reduction <add>, %14, %cst_4 [1] : vector<17x17xf32> to vector<17xf32>
    %16 = vector.shape_cast %15 : vector<17xf32> to vector<17x1xf32>
    %17 = tpu.reciprocal %16 {approx = true} : vector<17x1xf32> -> vector<17x1xf32>
    %18 = vector.broadcast %17 : vector<17x1xf32> to vector<17x17xf32>
    %19 = arith.mulf %14, %18 : vector<17x17xf32>
    %20 = arith.truncf %19 : vector<17x17xf32> to vector<17x17xbf16>
    %21 = arith.truncf %6 : vector<17x8xf32> to vector<17x8xbf16>
    %cst_5 = arith.constant dense<0.000000e+00> : vector<17x8xf32>
    %22 = tpu.matmul %20, %21, %cst_5 {dimension_numbers = #tpu.dot_dimension_numbers<[1], [0], [0], [1], [0, 0, 1, 1], [], []>} : vector<17x17xbf16>, vector<17x8xbf16>, vector<17x8xf32> -> vector<17x8xf32>
    %23 = vector.extract_strided_slice %1 {offsets = [0, 8], sizes = [17, 8], strides = [1, 1]} : vector<17x96xf32> to vector<17x8xf32>
    %cst_6 = arith.constant 0.353553385 : f32
    %24 = vector.broadcast %cst_6 : f32 to vector<17x8xf32>
    %25 = arith.mulf %23, %24 : vector<17x8xf32>
    %26 = vector.extract_strided_slice %1 {offsets = [0, 40], sizes = [17, 8], strides = [1, 1]} : vector<17x96xf32> to vector<17x8xf32>
    %27 = vector.extract_strided_slice %1 {offsets = [0, 72], sizes = [17, 8], strides = [1, 1]} : vector<17x96xf32> to vector<17x8xf32>
    %28 = arith.truncf %25 : vector<17x8xf32> to vector<17x8xbf16>
    %29 = arith.truncf %26 : vector<17x8xf32> to vector<17x8xbf16>
    %cst_7 = arith.constant dense<0.000000e+00> : vector<17x17xf32>
    %30 = tpu.matmul %28, %29, %cst_7 {dimension_numbers = #tpu.dot_dimension_numbers<[1], [1], [0], [0], [0, 0, 1, 0], [], []>} : vector<17x8xbf16>, vector<17x8xbf16>, vector<17x17xf32> -> vector<17x17xf32>
    %cst_8 = arith.constant dense<0xFF800000> : vector<17xf32>
    %31 = vector.multi_reduction <maximumf>, %30, %cst_8 [1] : vector<17x17xf32> to vector<17xf32>
    %32 = vector.shape_cast %31 : vector<17xf32> to vector<17x1xf32>
    %33 = vector.broadcast %32 : vector<17x1xf32> to vector<17x17xf32>
    %34 = arith.subf %30, %33 : vector<17x17xf32>
    %35 = math.exp %34 : vector<17x17xf32>
    %cst_9 = arith.constant dense<0.000000e+00> : vector<17xf32>
    %36 = vector.multi_reduction <add>, %35, %cst_9 [1] : vector<17x17xf32> to vector<17xf32>
    %37 = vector.shape_cast %36 : vector<17xf32> to vector<17x1xf32>
    %38 = tpu.reciprocal %37 {approx = true} : vector<17x1xf32> -> vector<17x1xf32>
    %39 = vector.broadcast %38 : vector<17x1xf32> to vector<17x17xf32>
    %40 = arith.mulf %35, %39 : vector<17x17xf32>
    %41 = arith.truncf %40 : vector<17x17xf32> to vector<17x17xbf16>
    %42 = arith.truncf %27 : vector<17x8xf32> to vector<17x8xbf16>
    %cst_10 = arith.constant dense<0.000000e+00> : vector<17x8xf32>
    %43 = tpu.matmul %41, %42, %cst_10 {dimension_numbers = #tpu.dot_dimension_numbers<[1], [0], [0], [1], [0, 0, 1, 1], [], []>} : vector<17x17xbf16>, vector<17x8xbf16>, vector<17x8xf32> -> vector<17x8xf32>
    %44 = vector.extract_strided_slice %1 {offsets = [0, 16], sizes = [17, 8], strides = [1, 1]} : vector<17x96xf32> to vector<17x8xf32>
    %cst_11 = arith.constant 0.353553385 : f32
    %45 = vector.broadcast %cst_11 : f32 to vector<17x8xf32>
    %46 = arith.mulf %44, %45 : vector<17x8xf32>
    %47 = vector.extract_strided_slice %1 {offsets = [0, 48], sizes = [17, 8], strides = [1, 1]} : vector<17x96xf32> to vector<17x8xf32>
    %48 = vector.extract_strided_slice %1 {offsets = [0, 80], sizes = [17, 8], strides = [1, 1]} : vector<17x96xf32> to vector<17x8xf32>
    %49 = arith.truncf %46 : vector<17x8xf32> to vector<17x8xbf16>
    %50 = arith.truncf %47 : vector<17x8xf32> to vector<17x8xbf16>
    %cst_12 = arith.constant dense<0.000000e+00> : vector<17x17xf32>
    %51 = tpu.matmul %49, %50, %cst_12 {dimension_numbers = #tpu.dot_dimension_numbers<[1], [1], [0], [0], [0, 0, 1, 0], [], []>} : vector<17x8xbf16>, vector<17x8xbf16>, vector<17x17xf32> -> vector<17x17xf32>
    %cst_13 = arith.constant dense<0xFF800000> : vector<17xf32>
    %52 = vector.multi_reduction <maximumf>, %51, %cst_13 [1] : vector<17x17xf32> to vector<17xf32>
    %53 = vector.shape_cast %52 : vector<17xf32> to vector<17x1xf32>
    %54 = vector.broadcast %53 : vector<17x1xf32> to vector<17x17xf32>
    %55 = arith.subf %51, %54 : vector<17x17xf32>
    %56 = math.exp %55 : vector<17x17xf32>
    %cst_14 = arith.constant dense<0.000000e+00> : vector<17xf32>
    %57 = vector.multi_reduction <add>, %56, %cst_14 [1] : vector<17x17xf32> to vector<17xf32>
    %58 = vector.shape_cast %57 : vector<17xf32> to vector<17x1xf32>
    %59 = tpu.reciprocal %58 {approx = true} : vector<17x1xf32> -> vector<17x1xf32>
    %60 = vector.broadcast %59 : vector<17x1xf32> to vector<17x17xf32>
    %61 = arith.mulf %56, %60 : vector<17x17xf32>
    %62 = arith.truncf %61 : vector<17x17xf32> to vector<17x17xbf16>
    %63 = arith.truncf %48 : vector<17x8xf32> to vector<17x8xbf16>
    %cst_15 = arith.constant dense<0.000000e+00> : vector<17x8xf32>
    %64 = tpu.matmul %62, %63, %cst_15 {dimension_numbers = #tpu.dot_dimension_numbers<[1], [0], [0], [1], [0, 0, 1, 1], [], []>} : vector<17x17xbf16>, vector<17x8xbf16>, vector<17x8xf32> -> vector<17x8xf32>
    %65 = vector.extract_strided_slice %1 {offsets = [0, 24], sizes = [17, 8], strides = [1, 1]} : vector<17x96xf32> to vector<17x8xf32>
    %cst_16 = arith.constant 0.353553385 : f32
    %66 = vector.broadcast %cst_16 : f32 to vector<17x8xf32>
    %67 = arith.mulf %65, %66 : vector<17x8xf32>
    %68 = vector.extract_strided_slice %1 {offsets = [0, 56], sizes = [17, 8], strides = [1, 1]} : vector<17x96xf32> to vector<17x8xf32>
    %69 = vector.extract_strided_slice %1 {offsets = [0, 88], sizes = [17, 8], strides = [1, 1]} : vector<17x96xf32> to vector<17x8xf32>
    %70 = arith.truncf %67 : vector<17x8xf32> to vector<17x8xbf16>
    %71 = arith.truncf %68 : vector<17x8xf32> to vector<17x8xbf16>
    %cst_17 = arith.constant dense<0.000000e+00> : vector<17x17xf32>
    %72 = tpu.matmul %70, %71, %cst_17 {dimension_numbers = #tpu.dot_dimension_numbers<[1], [1], [0], [0], [0, 0, 1, 0], [], []>} : vector<17x8xbf16>, vector<17x8xbf16>, vector<17x17xf32> -> vector<17x17xf32>
    %cst_18 = arith.constant dense<0xFF800000> : vector<17xf32>
    %73 = vector.multi_reduction <maximumf>, %72, %cst_18 [1] : vector<17x17xf32> to vector<17xf32>
    %74 = vector.shape_cast %73 : vector<17xf32> to vector<17x1xf32>
    %75 = vector.broadcast %74 : vector<17x1xf32> to vector<17x17xf32>
    %76 = arith.subf %72, %75 : vector<17x17xf32>
    %77 = math.exp %76 : vector<17x17xf32>
    %cst_19 = arith.constant dense<0.000000e+00> : vector<17xf32>
    %78 = vector.multi_reduction <add>, %77, %cst_19 [1] : vector<17x17xf32> to vector<17xf32>
    %79 = vector.shape_cast %78 : vector<17xf32> to vector<17x1xf32>
    %80 = tpu.reciprocal %79 {approx = true} : vector<17x1xf32> -> vector<17x1xf32>
    %81 = vector.broadcast %80 : vector<17x1xf32> to vector<17x17xf32>
    %82 = arith.mulf %77, %81 : vector<17x17xf32>
    %83 = arith.truncf %82 : vector<17x17xf32> to vector<17x17xbf16>
    %84 = arith.truncf %69 : vector<17x8xf32> to vector<17x8xbf16>
    %cst_20 = arith.constant dense<0.000000e+00> : vector<17x8xf32>
    %85 = tpu.matmul %83, %84, %cst_20 {dimension_numbers = #tpu.dot_dimension_numbers<[1], [0], [0], [1], [0, 0, 1, 1], [], []>} : vector<17x17xbf16>, vector<17x8xbf16>, vector<17x8xf32> -> vector<17x8xf32>
    %86 = tpu.concatenate %22, %43, %64, %85 in 1 : vector<17x8xf32>, vector<17x8xf32>, vector<17x8xf32>, vector<17x8xf32> -> vector<17x32xf32>
    %c0_21 = arith.constant 0 : index
    %c0_22 = arith.constant 0 : index
    %c0_23 = arith.constant 0 : index
    %87 = vector.load %arg2[%c0_21, %c0_22, %c0_23] : memref<1x17x32xf32, #tpu.memory_space<vmem>>, vector<1x17x32xf32>
    %88 = vector.shape_cast %87 : vector<1x17x32xf32> to vector<17x32xf32>
    %89 = vector.shape_cast %86 : vector<17x32xf32> to vector<1x17x32xf32>
    tpu.vector_store %arg2[%c0_21, %c0_22, %c0_23], %89 {strides = array<i32>} : memref<1x17x32xf32, #tpu.memory_space<vmem>>, vector<1x17x32xf32>,
    return
  }
  func.func @transform_0(%arg0: i32) -> (i32, i32, i32) {
    %c0_i32 = arith.constant 0 : i32
    %c0_i32_0 = arith.constant 0 : i32
    %c0_i32_1 = arith.constant 0 : i32
    return %arg0, %c0_i32, %c0_i32_0 : i32, i32, i32
  }
  func.func @transform_1(%arg0: i32) -> (i32, i32, i32) {
    %c0_i32 = arith.constant 0 : i32
    %c0_i32_0 = arith.constant 0 : i32
    %c0_i32_1 = arith.constant 0 : i32
    return %arg0, %c0_i32, %c0_i32_0 : i32, i32, i32
  }
}

module attributes {stable_mosaic.version = 11 : i64} {
  func.func @_fused_linear_kernel(%arg0: i32, %arg1: i32, %arg2: memref<34x32xf32, #tpu.memory_space<vmem>>, %arg3: memref<32x96xbf16, #tpu.memory_space<vmem>>, %arg4: memref<1x96xf32, #tpu.memory_space<vmem>>, %arg5: memref<1x32xf32, #tpu.memory_space<vmem>>, %arg6: memref<1x32xf32, #tpu.memory_space<vmem>>, %arg7: memref<34x96xf32, #tpu.memory_space<vmem>>) attributes {dimension_semantics = [#tpu.dimension_semantics<parallel>, #tpu.dimension_semantics<parallel>], iteration_bounds = array<i64: 1, 1>, scalar_prefetch = 0 : i64, scratch_operands = 0 : i64, tpu.core_type = #tpu.core_type<tc>, window_params = [{transform_indices = @transform_0, window_bounds = array<i64: 34, 32>}, {transform_indices = @transform_1, window_bounds = array<i64: 32, 96>}, {transform_indices = @transform_2, window_bounds = array<i64: 1, 96>}, {pipeline_mode = #tpu.pipeline_mode<synchronous>, transform_indices = @transform_3, window_bounds = array<i64: 1, 32>}, {pipeline_mode = #tpu.pipeline_mode<synchronous>, transform_indices = @transform_4, window_bounds = array<i64: 1, 32>}, {transform_indices = @transform_5, window_bounds = array<i64: 34, 96>}]} {
    %c0 = arith.constant 0 : index
    %c0_0 = arith.constant 0 : index
    %0 = vector.load %arg2[%c0, %c0_0] : memref<34x32xf32, #tpu.memory_space<vmem>>, vector<34x32xf32>
    %cst = arith.constant dense<0.000000e+00> : vector<34xf32>
    %1 = vector.multi_reduction <add>, %0, %cst [1] : vector<34x32xf32> to vector<34xf32>
    %2 = vector.shape_cast %1 : vector<34xf32> to vector<34x1xf32>
    %cst_1 = arith.constant 3.200000e+01 : f32
    %3 = vector.broadcast %cst_1 : f32 to vector<34x1xf32>
    %4 = arith.divf %2, %3 : vector<34x1xf32>
    %5 = vector.broadcast %4 : vector<34x1xf32> to vector<34x32xf32>
    %6 = arith.subf %0, %5 : vector<34x32xf32>
    %7 = arith.mulf %6, %6 : vector<34x32xf32>
    %cst_2 = arith.constant dense<0.000000e+00> : vector<34xf32>
    %8 = vector.multi_reduction <add>, %7, %cst_2 [1] : vector<34x32xf32> to vector<34xf32>
    %9 = vector.shape_cast %8 : vector<34xf32> to vector<34x1xf32>
    %cst_3 = arith.constant 3.200000e+01 : f32
    %10 = vector.broadcast %cst_3 : f32 to vector<34x1xf32>
    %11 = arith.divf %9, %10 : vector<34x1xf32>
    %cst_4 = arith.constant 9.99999974E-6 : f32
    %12 = vector.broadcast %cst_4 : f32 to vector<34x1xf32>
    %13 = arith.addf %11, %12 : vector<34x1xf32>
    %14 = math.rsqrt %13 : vector<34x1xf32>
    %15 = vector.broadcast %14 : vector<34x1xf32> to vector<34x32xf32>
    %16 = arith.mulf %6, %15 : vector<34x32xf32>
    %c0_5 = arith.constant 0 : index
    %c0_6 = arith.constant 0 : index
    %17 = vector.load %arg5[%c0_5, %c0_6] : memref<1x32xf32, #tpu.memory_space<vmem>>, vector<1x32xf32>
    %18 = vector.broadcast %17 : vector<1x32xf32> to vector<34x32xf32>
    %19 = arith.mulf %16, %18 : vector<34x32xf32>
    %c0_7 = arith.constant 0 : index
    %c0_8 = arith.constant 0 : index
    %20 = vector.load %arg6[%c0_7, %c0_8] : memref<1x32xf32, #tpu.memory_space<vmem>>, vector<1x32xf32>
    %21 = vector.broadcast %20 : vector<1x32xf32> to vector<34x32xf32>
    %22 = arith.addf %19, %21 : vector<34x32xf32>
    %23 = arith.truncf %22 : vector<34x32xf32> to vector<34x32xbf16>
    %c0_9 = arith.constant 0 : index
    %c0_10 = arith.constant 0 : index
    %24 = vector.load %arg3[%c0_9, %c0_10] : memref<32x96xbf16, #tpu.memory_space<vmem>>, vector<32x96xbf16>
    %cst_11 = arith.constant dense<0.000000e+00> : vector<34x96xf32>
    %25 = tpu.matmul %23, %24, %cst_11 {dimension_numbers = #tpu.dot_dimension_numbers<[1], [0], [0], [1], [0, 0, 1, 1], [], []>} : vector<34x32xbf16>, vector<32x96xbf16>, vector<34x96xf32> -> vector<34x96xf32>
    %c0_12 = arith.constant 0 : index
    %c0_13 = arith.constant 0 : index
    %26 = vector.load %arg4[%c0_12, %c0_13] : memref<1x96xf32, #tpu.memory_space<vmem>>, vector<1x96xf32>
    %27 = vector.broadcast %26 : vector<1x96xf32> to vector<34x96xf32>
    %28 = arith.addf %25, %27 : vector<34x96xf32>
    %c0_14 = arith.constant 0 : index
    %c0_15 = arith.constant 0 : index
    %29 = vector.load %arg7[%c0_14, %c0_15] : memref<34x96xf32, #tpu.memory_space<vmem>>, vector<34x96xf32>
    tpu.vector_store %arg7[%c0_14, %c0_15], %28 {strides = array<i32>} : memref<34x96xf32, #tpu.memory_space<vmem>>, vector<34x96xf32>,
    return
  }
  func.func @transform_0(%arg0: i32, %arg1: i32) -> (i32, i32) {
    %c0_i32 = arith.constant 0 : i32
    %c0_i32_0 = arith.constant 0 : i32
    return %arg0, %c0_i32 : i32, i32
  }
  func.func @transform_1(%arg0: i32, %arg1: i32) -> (i32, i32) {
    %c0_i32 = arith.constant 0 : i32
    %c0_i32_0 = arith.constant 0 : i32
    return %c0_i32, %arg1 : i32, i32
  }
  func.func @transform_2(%arg0: i32, %arg1: i32) -> (i32, i32) {
    %c0_i32 = arith.constant 0 : i32
    %c0_i32_0 = arith.constant 0 : i32
    return %c0_i32, %arg1 : i32, i32
  }
  func.func @transform_3(%arg0: i32, %arg1: i32) -> (i32, i32) {
    %c0_i32 = arith.constant 0 : i32
    %c0_i32_0 = arith.constant 0 : i32
    %c0_i32_1 = arith.constant 0 : i32
    return %c0_i32, %c0_i32_0 : i32, i32
  }
  func.func @transform_4(%arg0: i32, %arg1: i32) -> (i32, i32) {
    %c0_i32 = arith.constant 0 : i32
    %c0_i32_0 = arith.constant 0 : i32
    %c0_i32_1 = arith.constant 0 : i32
    return %c0_i32, %c0_i32_0 : i32, i32
  }
  func.func @transform_5(%arg0: i32, %arg1: i32) -> (i32, i32) {
    %c0_i32 = arith.constant 0 : i32
    return %arg0, %arg1 : i32, i32
  }
}

module attributes {stable_mosaic.version = 11 : i64} {
  func.func @_fused_linear_kernel(%arg0: i32, %arg1: i32, %arg2: memref<34x32xf32, #tpu.memory_space<vmem>>, %arg3: memref<32x32xbf16, #tpu.memory_space<vmem>>, %arg4: memref<1x32xf32, #tpu.memory_space<vmem>>, %arg5: memref<34x32xf32, #tpu.memory_space<vmem>>, %arg6: memref<34x32xf32, #tpu.memory_space<vmem>>) attributes {dimension_semantics = [#tpu.dimension_semantics<parallel>, #tpu.dimension_semantics<parallel>], iteration_bounds = array<i64: 1, 1>, scalar_prefetch = 0 : i64, scratch_operands = 0 : i64, tpu.core_type = #tpu.core_type<tc>, window_params = [{transform_indices = @transform_0, window_bounds = array<i64: 34, 32>}, {transform_indices = @transform_1, window_bounds = array<i64: 32, 32>}, {transform_indices = @transform_2, window_bounds = array<i64: 1, 32>}, {transform_indices = @transform_3, window_bounds = array<i64: 34, 32>}, {transform_indices = @transform_4, window_bounds = array<i64: 34, 32>}]} {
    %c0 = arith.constant 0 : index
    %c0_0 = arith.constant 0 : index
    %0 = vector.load %arg2[%c0, %c0_0] : memref<34x32xf32, #tpu.memory_space<vmem>>, vector<34x32xf32>
    %1 = arith.truncf %0 : vector<34x32xf32> to vector<34x32xbf16>
    %c0_1 = arith.constant 0 : index
    %c0_2 = arith.constant 0 : index
    %2 = vector.load %arg3[%c0_1, %c0_2] : memref<32x32xbf16, #tpu.memory_space<vmem>>, vector<32x32xbf16>
    %cst = arith.constant dense<0.000000e+00> : vector<34x32xf32>
    %3 = tpu.matmul %1, %2, %cst {dimension_numbers = #tpu.dot_dimension_numbers<[1], [0], [0], [1], [0, 0, 1, 1], [], []>} : vector<34x32xbf16>, vector<32x32xbf16>, vector<34x32xf32> -> vector<34x32xf32>
    %c0_3 = arith.constant 0 : index
    %c0_4 = arith.constant 0 : index
    %4 = vector.load %arg4[%c0_3, %c0_4] : memref<1x32xf32, #tpu.memory_space<vmem>>, vector<1x32xf32>
    %5 = vector.broadcast %4 : vector<1x32xf32> to vector<34x32xf32>
    %6 = arith.addf %3, %5 : vector<34x32xf32>
    %c0_5 = arith.constant 0 : index
    %c0_6 = arith.constant 0 : index
    %7 = vector.load %arg5[%c0_5, %c0_6] : memref<34x32xf32, #tpu.memory_space<vmem>>, vector<34x32xf32>
    %8 = arith.addf %6, %7 : vector<34x32xf32>
    %c0_7 = arith.constant 0 : index
    %c0_8 = arith.constant 0 : index
    %9 = vector.load %arg6[%c0_7, %c0_8] : memref<34x32xf32, #tpu.memory_space<vmem>>, vector<34x32xf32>
    tpu.vector_store %arg6[%c0_7, %c0_8], %8 {strides = array<i32>} : memref<34x32xf32, #tpu.memory_space<vmem>>, vector<34x32xf32>,
    return
  }
  func.func @transform_0(%arg0: i32, %arg1: i32) -> (i32, i32) {
    %c0_i32 = arith.constant 0 : i32
    %c0_i32_0 = arith.constant 0 : i32
    return %arg0, %c0_i32 : i32, i32
  }
  func.func @transform_1(%arg0: i32, %arg1: i32) -> (i32, i32) {
    %c0_i32 = arith.constant 0 : i32
    %c0_i32_0 = arith.constant 0 : i32
    return %c0_i32, %arg1 : i32, i32
  }
  func.func @transform_2(%arg0: i32, %arg1: i32) -> (i32, i32) {
    %c0_i32 = arith.constant 0 : i32
    %c0_i32_0 = arith.constant 0 : i32
    return %c0_i32, %arg1 : i32, i32
  }
  func.func @transform_3(%arg0: i32, %arg1: i32) -> (i32, i32) {
    %c0_i32 = arith.constant 0 : i32
    return %arg0, %arg1 : i32, i32
  }
  func.func @transform_4(%arg0: i32, %arg1: i32) -> (i32, i32) {
    %c0_i32 = arith.constant 0 : i32
    return %arg0, %arg1 : i32, i32
  }
}

module attributes {stable_mosaic.version = 11 : i64} {
  func.func @_fused_linear_kernel(%arg0: i32, %arg1: i32, %arg2: memref<34x32xf32, #tpu.memory_space<vmem>>, %arg3: memref<32x128xbf16, #tpu.memory_space<vmem>>, %arg4: memref<1x128xf32, #tpu.memory_space<vmem>>, %arg5: memref<1x32xf32, #tpu.memory_space<vmem>>, %arg6: memref<1x32xf32, #tpu.memory_space<vmem>>, %arg7: memref<34x128xf32, #tpu.memory_space<vmem>>) attributes {dimension_semantics = [#tpu.dimension_semantics<parallel>, #tpu.dimension_semantics<parallel>], iteration_bounds = array<i64: 1, 1>, scalar_prefetch = 0 : i64, scratch_operands = 0 : i64, tpu.core_type = #tpu.core_type<tc>, window_params = [{transform_indices = @transform_0, window_bounds = array<i64: 34, 32>}, {transform_indices = @transform_1, window_bounds = array<i64: 32, 128>}, {transform_indices = @transform_2, window_bounds = array<i64: 1, 128>}, {pipeline_mode = #tpu.pipeline_mode<synchronous>, transform_indices = @transform_3, window_bounds = array<i64: 1, 32>}, {pipeline_mode = #tpu.pipeline_mode<synchronous>, transform_indices = @transform_4, window_bounds = array<i64: 1, 32>}, {transform_indices = @transform_5, window_bounds = array<i64: 34, 128>}]} {
    %c0 = arith.constant 0 : index
    %c0_0 = arith.constant 0 : index
    %0 = vector.load %arg2[%c0, %c0_0] : memref<34x32xf32, #tpu.memory_space<vmem>>, vector<34x32xf32>
    %cst = arith.constant dense<0.000000e+00> : vector<34xf32>
    %1 = vector.multi_reduction <add>, %0, %cst [1] : vector<34x32xf32> to vector<34xf32>
    %2 = vector.shape_cast %1 : vector<34xf32> to vector<34x1xf32>
    %cst_1 = arith.constant 3.200000e+01 : f32
    %3 = vector.broadcast %cst_1 : f32 to vector<34x1xf32>
    %4 = arith.divf %2, %3 : vector<34x1xf32>
    %5 = vector.broadcast %4 : vector<34x1xf32> to vector<34x32xf32>
    %6 = arith.subf %0, %5 : vector<34x32xf32>
    %7 = arith.mulf %6, %6 : vector<34x32xf32>
    %cst_2 = arith.constant dense<0.000000e+00> : vector<34xf32>
    %8 = vector.multi_reduction <add>, %7, %cst_2 [1] : vector<34x32xf32> to vector<34xf32>
    %9 = vector.shape_cast %8 : vector<34xf32> to vector<34x1xf32>
    %cst_3 = arith.constant 3.200000e+01 : f32
    %10 = vector.broadcast %cst_3 : f32 to vector<34x1xf32>
    %11 = arith.divf %9, %10 : vector<34x1xf32>
    %cst_4 = arith.constant 9.99999974E-6 : f32
    %12 = vector.broadcast %cst_4 : f32 to vector<34x1xf32>
    %13 = arith.addf %11, %12 : vector<34x1xf32>
    %14 = math.rsqrt %13 : vector<34x1xf32>
    %15 = vector.broadcast %14 : vector<34x1xf32> to vector<34x32xf32>
    %16 = arith.mulf %6, %15 : vector<34x32xf32>
    %c0_5 = arith.constant 0 : index
    %c0_6 = arith.constant 0 : index
    %17 = vector.load %arg5[%c0_5, %c0_6] : memref<1x32xf32, #tpu.memory_space<vmem>>, vector<1x32xf32>
    %18 = vector.broadcast %17 : vector<1x32xf32> to vector<34x32xf32>
    %19 = arith.mulf %16, %18 : vector<34x32xf32>
    %c0_7 = arith.constant 0 : index
    %c0_8 = arith.constant 0 : index
    %20 = vector.load %arg6[%c0_7, %c0_8] : memref<1x32xf32, #tpu.memory_space<vmem>>, vector<1x32xf32>
    %21 = vector.broadcast %20 : vector<1x32xf32> to vector<34x32xf32>
    %22 = arith.addf %19, %21 : vector<34x32xf32>
    %23 = arith.truncf %22 : vector<34x32xf32> to vector<34x32xbf16>
    %c0_9 = arith.constant 0 : index
    %c0_10 = arith.constant 0 : index
    %24 = vector.load %arg3[%c0_9, %c0_10] : memref<32x128xbf16, #tpu.memory_space<vmem>>, vector<32x128xbf16>
    %cst_11 = arith.constant dense<0.000000e+00> : vector<34x128xf32>
    %25 = tpu.matmul %23, %24, %cst_11 {dimension_numbers = #tpu.dot_dimension_numbers<[1], [0], [0], [1], [0, 0, 1, 1], [], []>} : vector<34x32xbf16>, vector<32x128xbf16>, vector<34x128xf32> -> vector<34x128xf32>
    %c0_12 = arith.constant 0 : index
    %c0_13 = arith.constant 0 : index
    %26 = vector.load %arg4[%c0_12, %c0_13] : memref<1x128xf32, #tpu.memory_space<vmem>>, vector<1x128xf32>
    %27 = vector.broadcast %26 : vector<1x128xf32> to vector<34x128xf32>
    %28 = arith.addf %25, %27 : vector<34x128xf32>
    %cst_14 = arith.constant 1.702000e+00 : f32
    %29 = vector.broadcast %cst_14 : f32 to vector<34x128xf32>
    %30 = arith.mulf %29, %28 : vector<34x128xf32>
    %31 = arith.negf %30 : vector<34x128xf32>
    %32 = math.exp %31 : vector<34x128xf32>
    %cst_15 = arith.constant 1.000000e+00 : f32
    %33 = vector.broadcast %cst_15 : f32 to vector<34x128xf32>
    %34 = arith.addf %33, %32 : vector<34x128xf32>
    %35 = arith.divf %33, %34 : vector<34x128xf32>
    %36 = arith.mulf %28, %35 : vector<34x128xf32>
    %c0_16 = arith.constant 0 : index
    %c0_17 = arith.constant 0 : index
    %37 = vector.load %arg7[%c0_16, %c0_17] : memref<34x128xf32, #tpu.memory_space<vmem>>, vector<34x128xf32>
    tpu.vector_store %arg7[%c0_16, %c0_17], %36 {strides = array<i32>} : memref<34x128xf32, #tpu.memory_space<vmem>>, vector<34x128xf32>,
    return
  }
  func.func @transform_0(%arg0: i32, %arg1: i32) -> (i32, i32) {
    %c0_i32 = arith.constant 0 : i32
    %c0_i32_0 = arith.constant 0 : i32
    return %arg0, %c0_i32 : i32, i32
  }
  func.func @transform_1(%arg0: i32, %arg1: i32) -> (i32, i32) {
    %c0_i32 = arith.constant 0 : i32
    %c0_i32_0 = arith.constant 0 : i32
    return %c0_i32, %arg1 : i32, i32
  }
  func.func @transform_2(%arg0: i32, %arg1: i32) -> (i32, i32) {
    %c0_i32 = arith.constant 0 : i32
    %c0_i32_0 = arith.constant 0 : i32
    return %c0_i32, %arg1 : i32, i32
  }
  func.func @transform_3(%arg0: i32, %arg1: i32) -> (i32, i32) {
    %c0_i32 = arith.constant 0 : i32
    %c0_i32_0 = arith.constant 0 : i32
    %c0_i32_1 = arith.constant 0 : i32
    return %c0_i32, %c0_i32_0 : i32, i32
  }
  func.func @transform_4(%arg0: i32, %arg1: i32) -> (i32, i32) {
    %c0_i32 = arith.constant 0 : i32
    %c0_i32_0 = arith.constant 0 : i32
    %c0_i32_1 = arith.constant 0 : i32
    return %c0_i32, %c0_i32_0 : i32, i32
  }
  func.func @transform_5(%arg0: i32, %arg1: i32) -> (i32, i32) {
    %c0_i32 = arith.constant 0 : i32
    return %arg0, %arg1 : i32, i32
  }
}

module attributes {stable_mosaic.version = 11 : i64} {
  func.func @_fused_linear_kernel(%arg0: i32, %arg1: i32, %arg2: memref<34x128xf32, #tpu.memory_space<vmem>>, %arg3: memref<128x32xbf16, #tpu.memory_space<vmem>>, %arg4: memref<1x32xf32, #tpu.memory_space<vmem>>, %arg5: memref<34x32xf32, #tpu.memory_space<vmem>>, %arg6: memref<34x32xf32, #tpu.memory_space<vmem>>) attributes {dimension_semantics = [#tpu.dimension_semantics<parallel>, #tpu.dimension_semantics<parallel>], iteration_bounds = array<i64: 1, 1>, scalar_prefetch = 0 : i64, scratch_operands = 0 : i64, tpu.core_type = #tpu.core_type<tc>, window_params = [{transform_indices = @transform_0, window_bounds = array<i64: 34, 128>}, {transform_indices = @transform_1, window_bounds = array<i64: 128, 32>}, {transform_indices = @transform_2, window_bounds = array<i64: 1, 32>}, {transform_indices = @transform_3, window_bounds = array<i64: 34, 32>}, {transform_indices = @transform_4, window_bounds = array<i64: 34, 32>}]} {
    %c0 = arith.constant 0 : index
    %c0_0 = arith.constant 0 : index
    %0 = vector.load %arg2[%c0, %c0_0] : memref<34x128xf32, #tpu.memory_space<vmem>>, vector<34x128xf32>
    %1 = arith.truncf %0 : vector<34x128xf32> to vector<34x128xbf16>
    %c0_1 = arith.constant 0 : index
    %c0_2 = arith.constant 0 : index
    %2 = vector.load %arg3[%c0_1, %c0_2] : memref<128x32xbf16, #tpu.memory_space<vmem>>, vector<128x32xbf16>
    %cst = arith.constant dense<0.000000e+00> : vector<34x32xf32>
    %3 = tpu.matmul %1, %2, %cst {dimension_numbers = #tpu.dot_dimension_numbers<[1], [0], [0], [1], [0, 0, 1, 1], [], []>} : vector<34x128xbf16>, vector<128x32xbf16>, vector<34x32xf32> -> vector<34x32xf32>
    %c0_3 = arith.constant 0 : index
    %c0_4 = arith.constant 0 : index
    %4 = vector.load %arg4[%c0_3, %c0_4] : memref<1x32xf32, #tpu.memory_space<vmem>>, vector<1x32xf32>
    %5 = vector.broadcast %4 : vector<1x32xf32> to vector<34x32xf32>
    %6 = arith.addf %3, %5 : vector<34x32xf32>
    %c0_5 = arith.constant 0 : index
    %c0_6 = arith.constant 0 : index
    %7 = vector.load %arg5[%c0_5, %c0_6] : memref<34x32xf32, #tpu.memory_space<vmem>>, vector<34x32xf32>
    %8 = arith.addf %6, %7 : vector<34x32xf32>
    %c0_7 = arith.constant 0 : index
    %c0_8 = arith.constant 0 : index
    %9 = vector.load %arg6[%c0_7, %c0_8] : memref<34x32xf32, #tpu.memory_space<vmem>>, vector<34x32xf32>
    tpu.vector_store %arg6[%c0_7, %c0_8], %8 {strides = array<i32>} : memref<34x32xf32, #tpu.memory_space<vmem>>, vector<34x32xf32>,
    return
  }
  func.func @transform_0(%arg0: i32, %arg1: i32) -> (i32, i32) {
    %c0_i32 = arith.constant 0 : i32
    %c0_i32_0 = arith.constant 0 : i32
    return %arg0, %c0_i32 : i32, i32
  }
  func.func @transform_1(%arg0: i32, %arg1: i32) -> (i32, i32) {
    %c0_i32 = arith.constant 0 : i32
    %c0_i32_0 = arith.constant 0 : i32
    return %c0_i32, %arg1 : i32, i32
  }
  func.func @transform_2(%arg0: i32, %arg1: i32) -> (i32, i32) {
    %c0_i32 = arith.constant 0 : i32
    %c0_i32_0 = arith.constant 0 : i32
    return %c0_i32, %arg1 : i32, i32
  }
  func.func @transform_3(%arg0: i32, %arg1: i32) -> (i32, i32) {
    %c0_i32 = arith.constant 0 : i32
    return %arg0, %arg1 : i32, i32
  }
  func.func @transform_4(%arg0: i32, %arg1: i32) -> (i32, i32) {
    %c0_i32 = arith.constant 0 : i32
    return %arg0, %arg1 : i32, i32
  }
}

module attributes {stable_mosaic.version = 11 : i64} {
  func.func @_fused_linear_kernel(%arg0: i32, %arg1: i32, %arg2: memref<2x32xf32, #tpu.memory_space<vmem>>, %arg3: memref<32x32xbf16, #tpu.memory_space<vmem>>, %arg4: memref<1x32xf32, #tpu.memory_space<vmem>>, %arg5: memref<1x32xf32, #tpu.memory_space<vmem>>, %arg6: memref<1x32xf32, #tpu.memory_space<vmem>>, %arg7: memref<2x32xf32, #tpu.memory_space<vmem>>) attributes {dimension_semantics = [#tpu.dimension_semantics<parallel>, #tpu.dimension_semantics<parallel>], iteration_bounds = array<i64: 1, 1>, scalar_prefetch = 0 : i64, scratch_operands = 0 : i64, tpu.core_type = #tpu.core_type<tc>, window_params = [{transform_indices = @transform_0, window_bounds = array<i64: 2, 32>}, {transform_indices = @transform_1, window_bounds = array<i64: 32, 32>}, {transform_indices = @transform_2, window_bounds = array<i64: 1, 32>}, {pipeline_mode = #tpu.pipeline_mode<synchronous>, transform_indices = @transform_3, window_bounds = array<i64: 1, 32>}, {pipeline_mode = #tpu.pipeline_mode<synchronous>, transform_indices = @transform_4, window_bounds = array<i64: 1, 32>}, {transform_indices = @transform_5, window_bounds = array<i64: 2, 32>}]} {
    %c0 = arith.constant 0 : index
    %c0_0 = arith.constant 0 : index
    %0 = vector.load %arg2[%c0, %c0_0] : memref<2x32xf32, #tpu.memory_space<vmem>>, vector<2x32xf32>
    %cst = arith.constant dense<0.000000e+00> : vector<2xf32>
    %1 = vector.multi_reduction <add>, %0, %cst [1] : vector<2x32xf32> to vector<2xf32>
    %2 = vector.shape_cast %1 : vector<2xf32> to vector<2x1xf32>
    %cst_1 = arith.constant 3.200000e+01 : f32
    %3 = vector.broadcast %cst_1 : f32 to vector<2x1xf32>
    %4 = arith.divf %2, %3 : vector<2x1xf32>
    %5 = vector.broadcast %4 : vector<2x1xf32> to vector<2x32xf32>
    %6 = arith.subf %0, %5 : vector<2x32xf32>
    %7 = arith.mulf %6, %6 : vector<2x32xf32>
    %cst_2 = arith.constant dense<0.000000e+00> : vector<2xf32>
    %8 = vector.multi_reduction <add>, %7, %cst_2 [1] : vector<2x32xf32> to vector<2xf32>
    %9 = vector.shape_cast %8 : vector<2xf32> to vector<2x1xf32>
    %cst_3 = arith.constant 3.200000e+01 : f32
    %10 = vector.broadcast %cst_3 : f32 to vector<2x1xf32>
    %11 = arith.divf %9, %10 : vector<2x1xf32>
    %cst_4 = arith.constant 9.99999974E-6 : f32
    %12 = vector.broadcast %cst_4 : f32 to vector<2x1xf32>
    %13 = arith.addf %11, %12 : vector<2x1xf32>
    %14 = math.rsqrt %13 : vector<2x1xf32>
    %15 = vector.broadcast %14 : vector<2x1xf32> to vector<2x32xf32>
    %16 = arith.mulf %6, %15 : vector<2x32xf32>
    %c0_5 = arith.constant 0 : index
    %c0_6 = arith.constant 0 : index
    %17 = vector.load %arg5[%c0_5, %c0_6] : memref<1x32xf32, #tpu.memory_space<vmem>>, vector<1x32xf32>
    %18 = vector.broadcast %17 : vector<1x32xf32> to vector<2x32xf32>
    %19 = arith.mulf %16, %18 : vector<2x32xf32>
    %c0_7 = arith.constant 0 : index
    %c0_8 = arith.constant 0 : index
    %20 = vector.load %arg6[%c0_7, %c0_8] : memref<1x32xf32, #tpu.memory_space<vmem>>, vector<1x32xf32>
    %21 = vector.broadcast %20 : vector<1x32xf32> to vector<2x32xf32>
    %22 = arith.addf %19, %21 : vector<2x32xf32>
    %23 = arith.truncf %22 : vector<2x32xf32> to vector<2x32xbf16>
    %c0_9 = arith.constant 0 : index
    %c0_10 = arith.constant 0 : index
    %24 = vector.load %arg3[%c0_9, %c0_10] : memref<32x32xbf16, #tpu.memory_space<vmem>>, vector<32x32xbf16>
    %cst_11 = arith.constant dense<0.000000e+00> : vector<2x32xf32>
    %25 = tpu.matmul %23, %24, %cst_11 {dimension_numbers = #tpu.dot_dimension_numbers<[1], [0], [0], [1], [0, 0, 1, 1], [], []>} : vector<2x32xbf16>, vector<32x32xbf16>, vector<2x32xf32> -> vector<2x32xf32>
    %c0_12 = arith.constant 0 : index
    %c0_13 = arith.constant 0 : index
    %26 = vector.load %arg4[%c0_12, %c0_13] : memref<1x32xf32, #tpu.memory_space<vmem>>, vector<1x32xf32>
    %27 = vector.broadcast %26 : vector<1x32xf32> to vector<2x32xf32>
    %28 = arith.addf %25, %27 : vector<2x32xf32>
    %c0_14 = arith.constant 0 : index
    %c0_15 = arith.constant 0 : index
    %29 = vector.load %arg7[%c0_14, %c0_15] : memref<2x32xf32, #tpu.memory_space<vmem>>, vector<2x32xf32>
    tpu.vector_store %arg7[%c0_14, %c0_15], %28 {strides = array<i32>} : memref<2x32xf32, #tpu.memory_space<vmem>>, vector<2x32xf32>,
    return
  }
  func.func @transform_0(%arg0: i32, %arg1: i32) -> (i32, i32) {
    %c0_i32 = arith.constant 0 : i32
    %c0_i32_0 = arith.constant 0 : i32
    return %arg0, %c0_i32 : i32, i32
  }
  func.func @transform_1(%arg0: i32, %arg1: i32) -> (i32, i32) {
    %c0_i32 = arith.constant 0 : i32
    %c0_i32_0 = arith.constant 0 : i32
    return %c0_i32, %arg1 : i32, i32
  }
  func.func @transform_2(%arg0: i32, %arg1: i32) -> (i32, i32) {
    %c0_i32 = arith.constant 0 : i32
    %c0_i32_0 = arith.constant 0 : i32
    return %c0_i32, %arg1 : i32, i32
  }
  func.func @transform_3(%arg0: i32, %arg1: i32) -> (i32, i32) {
    %c0_i32 = arith.constant 0 : i32
    %c0_i32_0 = arith.constant 0 : i32
    %c0_i32_1 = arith.constant 0 : i32
    return %c0_i32, %c0_i32_0 : i32, i32
  }
  func.func @transform_4(%arg0: i32, %arg1: i32) -> (i32, i32) {
    %c0_i32 = arith.constant 0 : i32
    %c0_i32_0 = arith.constant 0 : i32
    %c0_i32_1 = arith.constant 0 : i32
    return %c0_i32, %c0_i32_0 : i32, i32
  }
  func.func @transform_5(%arg0: i32, %arg1: i32) -> (i32, i32) {
    %c0_i32 = arith.constant 0 : i32
    return %arg0, %arg1 : i32, i32
  }
}

</mosaic_0001>

<bundles_post_ra>
// kernel: encode_image.14
= control target key start
LH: loop header
LB: loop body
LE: loop exit
PB: predicated region body
PF: predicated region fallthrough
CT: control target
= control target key end

     0   :  { %vm19_vm0 = vcmask 261120   ;;  %vm32_vm1 = vcmask 254976   ;;  %s203_s0 = inlined_call_operand.vmem [shape: f32[34,32], index: 0, kind: input, shape index: {}]   ;;  %s204_s1 = inlined_call_operand.vmem [shape: f32[1,32], index: 1, kind: input, shape index: {}]   ;;  %s205_s2 = inlined_call_operand.vmem [shape: f32[1,32], index: 2, kind: input, shape index: {}]   ;;  %s206_s3 = inlined_call_operand.vmem [shape: f32[34,32], index: 3, kind: output, shape index: {}]  }
   0x1   :  { %v14_v0 = vld [vmem:[%s203_s0] sm:$0xff]  ;;  %v16_v1 = vld [vmem:[%s203_s0 + $0x10] sm:$0xff]  ;;  %v15_v2 = vld [vmem:[%s203_s0 + $0x8] sm:$0xff] }
   0x2   :  { %v20_v3 = vsel %vm19_vm0, %v14_v0, 0.0  ;;  %v26_v4 = vsel %vm19_vm0, %v16_v1, 0.0  ;;  %v17_v5 = vld [vmem:[%s203_s0 + $0x18] sm:$0xff]  ;;  %v23_v6 = vsel %vm19_vm0, %v15_v2, 0.0  ;;  %v18_v8 = vld [vmem:[%s203_s0 + $0x20] sm:$0x3] }
   0x3   :  { %21 = vadd.xlane.f32.xlu0 %v20_v3  ;;  %27 = vadd.xlane.f32.xlu1 %v26_v4  ;;  %v29_v7 = vsel %vm19_vm0, %v17_v5, 0.0  ;;  %v33_v9 = vsel %vm32_vm1, %v18_v8, 0.0  ;;  %v120_v51 = vld [vmem:[%s204_s1] ss:$0 sm:$0xff] }
   0x4   :  { %v121_v53 = vld [vmem:[%s205_s2] ss:$0 sm:$0xff] }
   0x7   :  { %24 = vadd.xlane.f32.xlu0 %v23_v6  ;;  %30 = vadd.xlane.f32.xlu1 %v29_v7 }
   0xb   :  { %34 = vadd.xlane.f32.xlu0 %v33_v9 }
  0x90   :  { %v22_v10 = vpop.xlane.xlu0 %21  ;;  %v28_v11 = vpop.xlane.xlu1 %27 }
  0x91   :  { %v37_v12 = vmul.f32 0.03125, %v22_v10  ;;  %v39_v13 = vmul.f32 0.03125, %v28_v11 }
  0x93   :  { %v42_v14 = vsub.f32 %v14_v0, %v37_v12  ;;  %v44_v15 = vsub.f32 %v16_v1, %v39_v13 }
  0x94   :  { %v25_v16 = vpop.xlane.xlu0 %24  ;;  %v31_v17 = vpop.xlane.xlu1 %30 }
  0x95   :  { %v38_v18 = vmul.f32 0.03125, %v25_v16  ;;  %v40_v19 = vmul.f32 0.03125, %v31_v17  ;;  %v47_v20 = vmul.f32 %v42_v14, %v42_v14  ;;  %v49_v21 = vmul.f32 %v44_v15, %v44_v15 }
  0x97   :  { %v43_v22 = vsub.f32 %v15_v2, %v38_v18  ;;  %v45_v23 = vsub.f32 %v17_v5, %v40_v19  ;;  %v52_v24 = vsel %vm19_vm0, %v47_v20, 0.0  ;;  %v58_v27 = vsel %vm19_vm0, %v49_v21, 0.0 }
  0x98   :  { %53 = vadd.xlane.f32.xlu1 %v52_v24  ;;  %v35_v25 = vpop.xlane.xlu0 %34 }
  0x99   :  { %v41_v26 = vmul.f32 0.03125, %v35_v25  ;;  %v48_v28 = vmul.f32 %v43_v22, %v43_v22  ;;  %v50_v29 = vmul.f32 %v45_v23, %v45_v23 }
  0x9b   :  { %v46_v30 = vsub.f32 %v18_v8, %v41_v26  ;;  %v55_v31 = vsel %vm19_vm0, %v48_v28, 0.0  ;;  %v61_v32 = vsel %vm19_vm0, %v50_v29, 0.0 }
  0x9c   :  { %59 = vadd.xlane.f32.xlu1 %v58_v27  ;;  %56 = vadd.xlane.f32.xlu0 %v55_v31 }
  0x9d   :  { %v51_v33 = vmul.f32 %v46_v30, %v46_v30 }
  0x9f   :  { %v64_v34 = vsel %vm32_vm1, %v51_v33, 0.0 }
  0xa0   :  { %62 = vadd.xlane.f32.xlu0 %v61_v32  ;;  %65 = vadd.xlane.f32.xlu1 %v64_v34 }
 0x125   :  { %v54_v35 = vpop.xlane.xlu1 %53 }
 0x126   :  { %v67_v36 = vmul.f32 0.03125, %v54_v35 }
 0x128   :  { %v72_v37 = vadd.f32 1e-05, %v67_v36 }
 0x129   :  { %v60_v38 = vpop.xlane.xlu1 %59  ;;  %v57_v39 = vpop.xlane.xlu0 %56 }
 0x12a   :  { %122 = vrsqrt.f32 %v72_v37  ;;  %v69_v40 = vmul.f32 0.03125, %v60_v38  ;;  %v68_v41 = vmul.f32 0.03125, %v57_v39 }
 0x12c   :  { %v74_v42 = vadd.f32 1e-05, %v69_v40  ;;  %v73_v43 = vadd.f32 1e-05, %v68_v41 }
 0x12d   :  { %v66_v44 = vpop.xlane.xlu1 %65  ;;  %v63_v45 = vpop.xlane.xlu0 %62 }
 0x12e   :  { %124 = vrsqrt.f32 %v74_v42  ;;  %v71_v46 = vmul.f32 0.03125, %v66_v44  ;;  %v70_v47 = vmul.f32 0.03125, %v63_v45 }
 0x12f   :  { %126 = vrsqrt.f32 %v73_v43 }
 0x130   :  { %v76_v48 = vadd.f32 1e-05, %v71_v46  ;;  %v75_v49 = vadd.f32 1e-05, %v70_v47 }
 0x132   :  { %128 = vrsqrt.f32 %v76_v48 }
 0x133   :  { %130 = vrsqrt.f32 %v75_v49 }
 0x134   :  { %v123_v50 = vpop.eup %122 }
 0x135   :  { %v82_v52 = vmul.f32 %v123_v50, %v42_v14 }
 0x137   :  { %v94_v54 = vmul.f32 %v120_v51, %v82_v52 }
 0x138   :  { %v125_v55 = vpop.eup %124 }
 0x139   :  { %v127_v56 = vpop.eup %126  ;;  %v106_v57 = vadd.f32 %v121_v53, %v94_v54  ;;  %v84_v58 = vmul.f32 %v125_v55, %v44_v15 }
 0x13a   :  { %v83_v59 = vmul.f32 %v127_v56, %v43_v22 }
 0x13b   :  { %111 = vst.msk [vmem:[%s206_s3] sm:$0xff] %vm19_vm0, %v106_v57  ;;  %v96_v60 = vmul.f32 %v120_v51, %v84_v58 }
 0x13c   :  { %v129_v61 = vpop.eup %128  ;;  %v95_v62 = vmul.f32 %v120_v51, %v83_v59 }
 0x13d   :  { %v131_v63 = vpop.eup %130  ;;  %v108_v0 = vadd.f32 %v121_v53, %v96_v60  ;;  %v86_v1 = vmul.f32 %v129_v61, %v46_v30 }
 0x13e   :  { %v107_v2 = vadd.f32 %v121_v53, %v95_v62  ;;  %v85_v3 = vmul.f32 %v131_v63, %v45_v23 }
 0x13f   :  { %113 = vst.msk [vmem:[%s206_s3 + $0x10] sm:$0xff] %vm19_vm0, %v108_v0  ;;  %v98_v4 = vmul.f32 %v120_v51, %v86_v1 }
 0x140   :  { %112 = vst.msk [vmem:[%s206_s3 + $0x8] sm:$0xff] %vm19_vm0, %v107_v2  ;;  %v97_v5 = vmul.f32 %v120_v51, %v85_v3 }
 0x141   :  { %v110_v6 = vadd.f32 %v121_v53, %v98_v4 }
 0x142   :  { %v109_v7 = vadd.f32 %v121_v53, %v97_v5 }
 0x143   :  { %115 = vst.msk [vmem:[%s206_s3 + $0x20] sm:$0x3] %vm32_vm1, %v110_v6 }
 0x144   :  { %114 = vst.msk [vmem:[%s206_s3 + $0x18] sm:$0xff] %vm19_vm0, %v109_v7 }

// kernel: encode_image.13
= control target key start
LH: loop header
LB: loop body
LE: loop exit
PB: predicated region body
PF: predicated region fallthrough
CT: control target
= control target key end

     0   :  { %vm52_vm0 = vcmask 392192   ;;  %vm108_vm1 = vcmask 261120   ;;  %s197_s1 = inlined_call_operand.vmem [shape: bf16[48,32], index: 1, kind: input, shape index: {}]   ;;  %s198_s0 = inlined_call_operand.vmem [shape: f32[32,48], index: 0, kind: input, shape index: {}]   ;;  %s199_s2 = inlined_call_operand.vmem [shape: f32[1,32], index: 2, kind: input, shape index: {}]   ;;  %s200_s3 = inlined_call_operand.vmem [shape: f32[32,32], index: 3, kind: output, shape index: {}]  }
   0x1   :  { %v138_v0 = vld [vmem:[%s197_s1] sm:$0xff]   ;;  %v139_v1 = vld [vmem:[%s197_s1 + $0x8] sm:$0xff]   ;;  %v140_v4 = vld [vmem:[%s197_s1 + $0x10] sm:$0xff]  }
   0x2   :  { %128 = vmatprep.subr.bf16.mxu0 %v138_v0  ;;  %v15_v2 = vld [vmem:[%s198_s0] sm:$0xff]  ;;  %v16_v3 = vld [vmem:[%s198_s0 + $0x8] sm:$0xff]  ;;  %v17_v6 = vld [vmem:[%s198_s0 + $0x10] sm:$0xff] }
   0x3   :  { %129 = vmatpush3.bf16.msra.mxu0 %v138_v0  ;;  %v19_v5 = vpack.c.bf16 %v16_v3, %v15_v2  ;;  %v18_v7 = vld [vmem:[%s198_s0 + $0x18] sm:$0xff]  ;;  %v117_v9 = vld [vmem:[%s199_s2] ss:$0 sm:$0xff] }
   0x4   :  { %130 = vmatprep.subr.bf16.mxu0 %v139_v1  ;;  %v20_v8 = vpack.c.bf16 %v18_v7, %v17_v6 }
   0x5   :  { %134 = vmatprep.mubr.msk.bf16.mxu0 %vm52_vm0, %v19_v5 }
   0x7   :  { %131 = vmatpush3.bf16.msra.mxu0 %v139_v1 }
   0x8   :  { %132 = vmatprep.subr.bf16.mxu0 %v140_v4 }
   0xb   :  { %133 = vmatpush3.bf16.msra.mxu0 %v140_v4 }
   0xe   :  { %135 = vmatmul.mubr.msk.bf16.vlgmr.msra.gmra.mrb[0].mxu0 %vm52_vm0, %v20_v8 }
  0xe1   :  { %v136_v10 = vpop.f32.mrb[0].mxu0 }
  0xe2   :  { %v102_v11 = vadd.f32 %v136_v10, %v117_v9  ;;  %v93_v12 = vpop.f32.mrb[1].mxu0 }
  0xe3   :  { %v94_v13 = vadd.f32 %v117_v9, %v93_v12  ;;  %v137_v14 = vpop.f32.mrb[2].mxu0 }
  0xe4   :  { %111 = vst.msk [vmem:[%s200_s3 + $0x10] sm:$0xff] %vm108_vm1, %v102_v11  ;;  %v105_v15 = vadd.f32 %v137_v14, %v117_v9  ;;  %v96_v16 = vpop.f32.mrb[3].mxu0 }
  0xe5   :  { %109 = vst.msk [vmem:[%s200_s3] sm:$0xff] %vm108_vm1, %v94_v13  ;;  %v97_v17 = vadd.f32 %v117_v9, %v96_v16 }
  0xe6   :  { %112 = vst.msk [vmem:[%s200_s3 + $0x18] sm:$0xff] %vm108_vm1, %v105_v15 }
  0xe7   :  { %110 = vst.msk [vmem:[%s200_s3 + $0x8] sm:$0xff] %vm108_vm1, %v97_v17 }

// kernel: encode_image.15
= control target key start
LH: loop header
LB: loop body
LE: loop exit
PB: predicated region body
PF: predicated region fallthrough
CT: control target
= control target key end

     0   :  { %vm26_vm0 = vcmask 261120   ;;  %vm39_vm1 = vcmask 254976   ;;  %v267_v36 = vmov 0.0   ;;  %vm268_vm2 = vmmov 0   ;;  %s379_s0 = inlined_call_operand.vmem [shape: f32[34,32], index: 0, kind: input, shape index: {}]   ;;  %s380_s1 = inlined_call_operand.vmem [shape: bf16[32,96], index: 1, kind: input, shape index: {}]   ;;  %s381_s3 = inlined_call_operand.vmem [shape: f32[1,32], index: 3, kind: input, shape index: {}]   ;;  %s382_s4 = inlined_call_operand.vmem [shape: f32[1,32], index: 4, kind: input, shape index: {}]   ;;  %s383_s2 = inlined_call_operand.vmem [shape: f32[1,96], index: 2, kind: input, shape index: {}]   ;;  %s384_s5 = inlined_call_operand.vmem [shape: f32[34,96], index: 5, kind: output, shape index: {}]  }
   0x1   :  { %v23_v0 = vld [vmem:[%s379_s0 + $0x10] sm:$0xff]  ;;  %v24_v1 = vld [vmem:[%s379_s0 + $0x18] sm:$0xff]  ;;  %v21_v2 = vld [vmem:[%s379_s0] sm:$0xff]  ;;  %249 = vmatprep.subr.bf16.mxu1 %v267_v36  ;;  %233 = vmatprep.subr.bf16.mxu0 %v267_v36  ;;  %vm209_vm3 = vcmask 785408   ;;  %vm214_vm4 = vcmask 779264  }
   0x2   :  { %v33_v3 = vsel %vm26_vm0, %v23_v0, 0.0  ;;  %v27_v4 = vsel %vm26_vm0, %v21_v2, 0.0  ;;  %v22_v5 = vld [vmem:[%s379_s0 + $0x8] sm:$0xff]  ;;  %v36_v6 = vsel %vm26_vm0, %v24_v1, 0.0  ;;  %v25_v8 = vld [vmem:[%s379_s0 + $0x20] sm:$0x3]  ;;  %241 = vmatprep.mubr.msk.bf16.mxu1 %vm268_vm2, %v267_v36  ;;  %237 = vmatprep.mubr.msk.bf16.mxu0 %vm268_vm2, %v267_v36 }
   0x3   :  { %34 = vadd.xlane.f32.xlu0 %v33_v3  ;;  %28 = vadd.xlane.f32.xlu1 %v27_v4  ;;  %v30_v7 = vsel %vm26_vm0, %v22_v5, 0.0  ;;  %v40_v9 = vsel %vm39_vm1, %v25_v8, 0.0  ;;  %v255_v35 = vld [vmem:[%s380_s1] sm:$0xff]   ;;  %v256_v37 = vld [vmem:[%s380_s1 + $0x8] sm:$0xff]  }
   0x4   :  { %251 = vmatpush3.bf16.msra.mxu1 %v255_v35  ;;  %234 = vmatpush3.bf16.msra.mxu0 %v255_v35  ;;  %v220_v55 = vld [vmem:[%s381_s3] ss:$0 sm:$0xff] }
   0x5   :  { %250 = vmatprep.subr.bf16.mxu1 %v267_v36  ;;  %235 = vmatprep.subr.bf16.mxu0 %v267_v36  ;;  %v221_v61 = vld [vmem:[%s382_s4] ss:$0 sm:$0xff] }
   0x7   :  { %37 = vadd.xlane.f32.xlu0 %v36_v6  ;;  %31 = vadd.xlane.f32.xlu1 %v30_v7 }
   0x8   :  { %252 = vmatpush3.bf16.msra.mxu1 %v256_v37  ;;  %236 = vmatpush3.bf16.msra.mxu0 %v256_v37 }
   0xb   :  { %41 = vadd.xlane.f32.xlu0 %v40_v9 }
  0x90   :  { %v35_v10 = vpop.xlane.xlu0 %34  ;;  %v29_v11 = vpop.xlane.xlu1 %28 }
  0x91   :  { %v46_v12 = vmul.f32 0.03125, %v35_v10  ;;  %v44_v13 = vmul.f32 0.03125, %v29_v11 }
  0x93   :  { %v319_v14 = vsub.f32 %v23_v0, %v46_v12  ;;  %v321_v15 = vsub.f32 %v21_v2, %v44_v13 }
  0x94   :  { %v38_v16 = vpop.xlane.xlu0 %37  ;;  %v32_v17 = vpop.xlane.xlu1 %31 }
  0x95   :  { %v47_v18 = vmul.f32 0.03125, %v38_v16  ;;  %v56_v19 = vmul.f32 %v319_v14, %v319_v14  ;;  %v45_v20 = vmul.f32 0.03125, %v32_v17  ;;  %v54_v21 = vmul.f32 %v321_v15, %v321_v15 }
  0x97   :  { %v52_v22 = vsub.f32 %v24_v1, %v47_v18  ;;  %v65_v23 = vsel %vm26_vm0, %v56_v19, 0.0  ;;  %v328_v24 = vsub.f32 %v22_v5, %v45_v20  ;;  %v59_v28 = vsel %vm26_vm0, %v54_v21, 0.0 }
  0x98   :  { %v42_v25 = vpop.xlane.xlu0 %41  ;;  %66 = vadd.xlane.f32.xlu1 %v65_v23 }
  0x99   :  { %v48_v26 = vmul.f32 0.03125, %v42_v25  ;;  %v57_v27 = vmul.f32 %v52_v22, %v52_v22  ;;  %v55_v29 = vmul.f32 %v328_v24, %v328_v24 }
  0x9b   :  { %v53_v30 = vsub.f32 %v25_v8, %v48_v26  ;;  %v68_v31 = vsel %vm26_vm0, %v57_v27, 0.0  ;;  %v62_v33 = vsel %vm26_vm0, %v55_v29, 0.0 }
  0x9c   :  { %69 = vadd.xlane.f32.xlu0 %v68_v31  ;;  %60 = vadd.xlane.f32.xlu1 %v59_v28 }
  0x9d   :  { %v58_v32 = vmul.f32 %v53_v30, %v53_v30 }
  0x9f   :  { %v71_v34 = vsel %vm39_vm1, %v58_v32, 0.0 }
  0xa0   :  { %72 = vadd.xlane.f32.xlu1 %v71_v34  ;;  %63 = vadd.xlane.f32.xlu0 %v62_v33 }
 0x125   :  { %v67_v38 = vpop.xlane.xlu1 %66 }
 0x126   :  { %v76_v39 = vmul.f32 0.03125, %v67_v38 }
 0x128   :  { %v81_v40 = vadd.f32 1e-05, %v76_v39 }
 0x129   :  { %v70_v41 = vpop.xlane.xlu0 %69  ;;  %v61_v42 = vpop.xlane.xlu1 %60 }
 0x12a   :  { %257 = vrsqrt.f32 %v81_v40  ;;  %v77_v43 = vmul.f32 0.03125, %v70_v41  ;;  %v74_v44 = vmul.f32 0.03125, %v61_v42 }
 0x12c   :  { %v82_v45 = vadd.f32 1e-05, %v77_v43  ;;  %v79_v46 = vadd.f32 1e-05, %v74_v44 }
 0x12d   :  { %v64_v47 = vpop.xlane.xlu0 %63  ;;  %v73_v48 = vpop.xlane.xlu1 %72 }
 0x12e   :  { %259 = vrsqrt.f32 %v82_v45  ;;  %v75_v49 = vmul.f32 0.03125, %v64_v47  ;;  %v78_v50 = vmul.f32 0.03125, %v73_v48 }
 0x12f   :  { %261 = vrsqrt.f32 %v79_v46 }
 0x130   :  { %v80_v51 = vadd.f32 1e-05, %v75_v49  ;;  %v83_v52 = vadd.f32 1e-05, %v78_v50 }
 0x132   :  { %263 = vrsqrt.f32 %v80_v51 }
 0x133   :  { %265 = vrsqrt.f32 %v83_v52 }
 0x134   :  { %v258_v53 = vpop.eup %257 }
 0x135   :  { %v91_v54 = vmul.f32 %v258_v53, %v319_v14  ;;  %v222_v14 = vld [vmem:[%s383_s2] ss:$0 sm:$0xff] }
 0x137   :  { %v103_v59 = vmul.f32 %v220_v55, %v91_v54 }
 0x138   :  { %v260_v56 = vpop.eup %259 }
 0x139   :  { %v262_v57 = vpop.eup %261  ;;  %v92_v58 = vmul.f32 %v260_v56, %v52_v22  ;;  %v115_v2 = vadd.f32 %v221_v61, %v103_v59 }
 0x13a   :  { %v89_v60 = vmul.f32 %v262_v57, %v321_v15 }
 0x13b   :  { %v104_v62 = vmul.f32 %v220_v55, %v92_v58 }
 0x13c   :  { %v264_v63 = vpop.eup %263  ;;  %v101_v4 = vmul.f32 %v220_v55, %v89_v60 }
 0x13d   :  { %v266_v0 = vpop.eup %265  ;;  %v90_v1 = vmul.f32 %v264_v63, %v328_v24  ;;  %v116_v3 = vadd.f32 %v221_v61, %v104_v62 }
 0x13e   :  { %v93_v5 = vmul.f32 %v266_v0, %v53_v30  ;;  %v113_v9 = vadd.f32 %v221_v61, %v101_v4 }
 0x13f   :  { %v119_v6 = vpack.c.bf16 %v116_v3, %v115_v2  ;;  %v102_v7 = vmul.f32 %v220_v55, %v90_v1 }
 0x140   :  { %v105_v8 = vmul.f32 %v220_v55, %v93_v5 }
 0x141   :  { %242 = vmatmul.mubr.msk.bf16.vlgmr.msra.gmra.mrb[0].mxu1 %vm26_vm0, %v119_v6  ;;  %v114_v10 = vadd.f32 %v221_v61, %v102_v7 }
 0x142   :  { %245 = vmatprep.mubr.msk.bf16.mxu1 %vm268_vm2, %v267_v36  ;;  %v117_v12 = vadd.f32 %v221_v61, %v105_v8 }
 0x143   :  { %v118_v11 = vpack.c.bf16 %v114_v10, %v113_v9 }
 0x144   :  { %v120_v13 = vpack.c.bf16 %v117_v12, %v117_v12 }
 0x145   :  { %238 = vmatmul.mubr.msk.bf16.vlgmr.msra.gmra.mrb[0].mxu0 %vm26_vm0, %v118_v11 }
 0x149   :  { %246 = vmatmul.mubr.msk.bf16.gmra.mrb[4].mxu1 %vm26_vm0, %v120_v13 }
 0x214   :  { %v195_v15 = vpop.f32.mrb[0].mxu1 }
 0x215   :  { %v196_v16 = vadd.f32 %v222_v14, %v195_v15  ;;  %v243_v17 = vpop.f32.mrb[1].mxu1 }
 0x216   :  { %v198_v18 = vpop.f32.mrb[2].mxu1 }
 0x217   :  { %212 = vst.msk [vmem:[%s384_s5 + $0x10] sm:$0xff] %vm209_vm3, %v196_v16  ;;  %v199_v19 = vadd.f32 %v222_v14, %v198_v18  ;;  %v244_v20 = vpop.f32.mrb[3].mxu1 }
 0x218   :  { %v187_v21 = vpop.f32.mrb[0].mxu0 }
 0x219   :  { %213 = vst.msk [vmem:[%s384_s5 + $0x18] sm:$0xff] %vm209_vm3, %v199_v19  ;;  %v188_v22 = vadd.f32 %v222_v14, %v187_v21  ;;  %v239_v23 = vpop.f32.mrb[1].mxu0 }
 0x21a   :  { %v190_v24 = vpop.f32.mrb[2].mxu0 }
 0x21b   :  { %210 = vst.msk [vmem:[%s384_s5] sm:$0xff] %vm209_vm3, %v188_v22  ;;  %v191_v25 = vadd.f32 %v222_v14, %v190_v24  ;;  %v240_v26 = vpop.f32.mrb[3].mxu0 }
 0x21c   :  { %v203_v27 = vpop.f32.mrb[4].mxu1 }
 0x21d   :  { %211 = vst.msk [vmem:[%s384_s5 + $0x8] sm:$0xff] %vm209_vm3, %v191_v25  ;;  %v204_v28 = vadd.f32 %v222_v14, %v203_v27  ;;  %v247_v29 = vpop.f32.mrb[5].mxu1 }
 0x21e   :  { %v206_v30 = vpop.f32.mrb[6].mxu1 }
 0x21f   :  { %215 = vst.msk [vmem:[%s384_s5 + $0x20] sm:$0x3] %vm214_vm4, %v204_v28  ;;  %v248_v31 = vpop.f32.mrb[7].mxu1 }

// kernel: encode_image.16
= control target key start
LH: loop header
LB: loop body
LE: loop exit
PB: predicated region body
PF: predicated region fallthrough
CT: control target
= control target key end

     0   :  { %s1135_s6 = smov 0   ;;  %s1284_s0 = inlined_call_operand.vmem [shape: f32[2,17,96], index: 0, kind: input, shape index: {}]   ;;  %s1285_s1 = inlined_call_operand.vmem [shape: f32[2,17,32], index: 1, kind: output, shape index: {}]  }
   0x1 LB: > { %s901_s7 = sadd.s32 4294967295, %s1108_s6   ;;  %p905_p0 = scmp.ge.s32.totalorder %s1108_s6, 1  ;;  %s1108_s6 = sphi %s1135_s6, %s11_s6  }
   0x2   : > { %p87_p1 = scmp.lt.s32.totalorder %s1108_s6, 3 }
   0x4   : > { %p88_p2 = pnand %p905_p0, %p87_p1 }
   0x5   : > { %p107_p3 = scmp.lt.s32.totalorder (!%p88_p2), %s901_s7, 1  ;;  %s1110_s12 = smov (!%p88_p2), 96   ;;  %vm134_vm0 = vcmask (!%p88_p2), 64512   ;;  %vm202_vm1 = vcmask (!%p88_p2), 131072   ;;  %vm195_vm2 = vcmask (!%p88_p2), 138240   ;;  %vm243_vm3 = vcmask (!%p88_p2), 1040384  }
   0x6   : > { %91 = sbr.rel (%p88_p2) target bundleno = 2684 (0xa7c), region = 24  ;;  %s1111_s13 = smov (!%p88_p2), 64   ;;  %v1114_v40 = vmov (!%p88_p2), 0   ;;  %vm833_vm4 = vcmask (!%p88_p2), 130048   ;;  %vm837_vm5 = vcmask (!%p88_p2), 195584   ;;  %vm841_vm6 = vcmask (!%p88_p2), 261120  }
   0x7   : > { %s1112_s14 = smov (!%p88_p2), 88   ;;  %s1113_s15 = smov (!%p88_p2), 120   ;;  %v1181_v41 = vsel (!%p88_p2), %vm243_vm3, 65535, %v1114_v40  ;;  %vm844_vm7 = vcmask (!%p88_p2), 253952  }
   0x8   : > { %s1115_s16 = smov (!%p88_p2), 56   ;;  %s1116_s17 = smov (!%p88_p2), 80  }
   0x9   : > { %s1117_s18 = smov (!%p88_p2), 112   ;;  %s1118_s19 = smov (!%p88_p2), 48  }
   0xa   : > { %s1119_s20 = smov (!%p88_p2), 72   ;;  %s1120_s21 = smov (!%p88_p2), 104  }
   0xb   : > { %s1121_s22 = smov (!%p88_p2), 40   ;;  %s1122_s23 = smov (!%p88_p2), 8  }
   0xc   : > { %s1123_s24 = smov (!%p88_p2), 16   ;;  %s1124_s25 = smov (!%p88_p2), 24  }
   0xd   : > { %s1287_s7 = smov (!%p107_p3, %s901_s7), 1 }
   0xe   : > { %s1030_s8 = smul.u32 24, %s1287_s7 }
  0x10   : > { %s111_s11 = scalar_lea.vmem %s1284_s0, %s1030_s8  ;;  %s116_s28 = scalar_lea.vmem %s1285_s1, %s1030_s8 }
  0x11   : > { %v118_v0 = vld [vmem:[%s111_s11] sm:$0xff]  ;;  %v119_v1 = vld [vmem:[%s111_s11 + $0x8] sm:$0xff]  ;;  %v120_v2 = vld [vmem:[%s111_s11 + $0x10] sm:$0x1] }
  0x12   : > { %v1151_v3 = vpack.c.bf16 %v119_v1, %v118_v0  ;;  %v121_v4 = vmul.f32 0.35355338, %v118_v0  ;;  %v122_v5 = vmul.f32 0.35355338, %v119_v1  ;;  %v1154_v6 = vpack.c.bf16 %v120_v2, %v120_v2 }
  0x13   : > { %v123_v12 = vmul.f32 0.35355338, %v120_v2 }
  0x14   : > { %130 = vrot.lane.b32.xlu0 %v1151_v3, %s1110_s12  ;;  %v1156_v7 = vpack.c.bf16 %v122_v5, %v121_v4 }
  0x15   : > { %v1165_v13 = vpack.c.bf16 %v123_v12, %v123_v12 }
  0x16   : > { %962 = vmatprep.mubr.msk.bf16.mxu0 %vm134_vm0, %v1156_v7 }
  0x18   : > { %132 = vrot.lane.b32.xlu0 %v1154_v6, %s1110_s12 }
  0x86   : > { %v131_v8 = vpop.permute.xlu0 %130 }
  0x87   : > { %1022 = vmatprep.subr.msk.bf16.mxu0 %vm134_vm0, %v131_v8  ;;  %v142_v9 = vsel %vm134_vm0, %v131_v8, 0 }
  0x88   : > { %959 = vmatpush3.bf16.xpose.msra.mxu0 %v142_v9 }
  0x8a   : > { %v133_v10 = vpop.permute.xlu0 %132 }
  0x8b   : > { %1023 = vmatprep.subr.msk.bf16.mxu0 %vm134_vm0, %v133_v10  ;;  %v145_v11 = vsel %vm134_vm0, %v133_v10, 0 }
  0x90   : > { %961 = vmatpush3.bf16.xpose.msra.mxu0 %v145_v11 }
  0x97   : > { %963 = vmatmul.mubr.msk.bf16.vlgmr.msra.gmra.mrb[0].mxu0 %vm134_vm0, %v1165_v13 }
 0x16a   : > { %v964_v14 = vpop.f32.mrb[0].mxu0 }
 0x16b   : > { %v181_v15 = vpop.f32.mrb[1].mxu0  ;;  %v203_v16 = vsel %vm202_vm1, %v964_v14, -inf }
 0x16c   : > { %204 = vmax.xlane.f32.xlu0 %v203_v16  ;;  %v965_v17 = vpop.f32.mrb[2].mxu0  ;;  %v196_v18 = vsel %vm195_vm2, %v181_v15, -inf }
 0x16d   : > { %197 = vmax.xlane.f32.xlu1 %v196_v18  ;;  %v184_v19 = vpop.f32.mrb[3].mxu0 }
 0x16e   : > { %v199_v20 = vsel %vm195_vm2, %v184_v19, -inf }
 0x171   : > { %200 = vmax.xlane.f32.xlu1 %v199_v20 }
 0x182   : > { %232 = vrot.lane.b32.xlu1 %v1151_v3, %s1111_s13  ;;  %303 = vrot.lane.b32.xlu0 %v1151_v3, %s1112_s14 }
 0x1f9   : > { %v205_v21 = vpop.xlane.xlu0 %204 }
 0x1fa   : > { %v208_v22 = vsub.f32 %v964_v14, %v205_v21  ;;  %v198_v23 = vpop.xlane.xlu1 %197 }
 0x1fb   : > { %v206_v24 = vsub.f32 %v181_v15, %v198_v23 }
 0x1fc   : > { %v213_v25 = vmul.f32 1.442695, %v208_v22 }
 0x1fd   : > { %v209_v26 = vmul.f32 1.442695, %v206_v24  ;;  %v304_v44 = vpop.permute.xlu0 %303 }
 0x1fe   : > { %1054 = vpow2.f32 %v213_v25  ;;  %v201_v27 = vpop.xlane.xlu1 %200  ;;  %v314_v53 = vsel %vm134_vm0, %v304_v44, 0 }
 0x1ff   : > { %v207_v28 = vsub.f32 %v184_v19, %v201_v27  ;;  %1056 = vpow2.f32 %v209_v26 }
 0x201   : > { %v211_v29 = vmul.f32 1.442695, %v207_v28 }
 0x202   : > { %v233_v30 = vpop.permute.xlu1 %232 }
 0x203   : > { %966 = vmatprep.subr.bf16.mxu1 %v233_v30  ;;  %1058 = vpow2.f32 %v211_v29 }
 0x204   : > { %967 = vmatpush3.bf16.msra.mxu1 %v233_v30 }
 0x208   : > { %v1055_v31 = vpop.eup %1054 }
 0x209   : > { %v221_v32 = vsel %vm202_vm1, %v1055_v31, 0.0  ;;  %v1057_v33 = vpop.eup %1056 }
 0x20a   : > { %222 = vadd.xlane.f32.xlu1 %v221_v32  ;;  %v215_v34 = vsel %vm195_vm2, %v1057_v33, 0.0 }
 0x20d   : > { %v1059_v35 = vpop.eup %1058 }
 0x20e   : > { %216 = vadd.xlane.f32.xlu1 %v215_v34  ;;  %v218_v36 = vsel %vm195_vm2, %v1059_v35, 0.0 }
 0x212   : > { %219 = vadd.xlane.f32.xlu1 %v218_v36 }
 0x223   : > { %234 = vrot.lane.b32.xlu1 %v1154_v6, %s1111_s13 }
 0x227   : > { %305 = vrot.lane.b32.xlu1 %v1154_v6, %s1112_s14 }
 0x22b   : > { %299 = vrot.lane.b32.xlu1 %v1156_v7, %s1113_s15 }
 0x22f   : > { %301 = vrot.lane.b32.xlu1 %v1165_v13, %s1113_s15 }
 0x297   : > { %v223_v37 = vpop.xlane.xlu1 %222 }
 0x298   : > { %1060 = vrcp.f32 %v223_v37 }
 0x29b   : > { %v217_v38 = vpop.xlane.xlu1 %216 }
 0x29c   : > { %1062 = vrcp.f32 %v217_v38 }
 0x29f   : > { %v220_v39 = vpop.xlane.xlu1 %219 }
 0x2a0   : > { %1064 = vrcp.f32 %v220_v39 }
 0x2a2   : > { %v1061_v45 = vpop.eup %1060 }
 0x2a3   : > { %v235_v42 = vpop.permute.xlu1 %234  ;;  %v229_v49 = vmul.f32 %v1061_v45, %v1055_v31 }
 0x2a4   : > { %v247_v43 = vand.u32 %v1181_v41, %v235_v42 }
 0x2a5   : > { %v231_v54 = vpack.c.bf16 %v229_v49, %v229_v49 }
 0x2a6   : > { %968 = vmatprep.subr.bf16.mxu1 %v247_v43  ;;  %v1063_v46 = vpop.eup %1062 }
 0x2a7   : > { %969 = vmatpush3.bf16.msra.mxu1 %v247_v43  ;;  %v306_v47 = vpop.permute.xlu1 %305  ;;  %v227_v50 = vmul.f32 %v1063_v46, %v1057_v33 }
 0x2a8   : > { %1024 = vmatprep.subr.msk.bf16.mxu1 %vm134_vm0, %v304_v44  ;;  %v317_v56 = vsel %vm134_vm0, %v306_v47, 0 }
 0x2aa   : > { %v1065_v48 = vpop.eup %1064 }
 0x2ab   : > { %v228_v51 = vmul.f32 %v1065_v48, %v1059_v35  ;;  %v300_v55 = vpop.permute.xlu1 %299 }
 0x2ad   : > { %v230_v52 = vpack.c.bf16 %v228_v51, %v227_v50 }
 0x2af   : > { %970 = vmatprep.mubr.msk.bf16.mxu1 %vm195_vm2, %v230_v52  ;;  %v302_v57 = vpop.permute.xlu1 %301 }
 0x2b0   : > { %971 = vmatmul.mubr.msk.bf16.vlgmr.msra.gmra.mrb[0].mxu1 %vm195_vm2, %v231_v54 }
 0x2b1   : > { %975 = vmatpush3.bf16.xpose.msra.mxu1 %v314_v53  ;;  %978 = vmatprep.mubr.msk.bf16.mxu1 %vm134_vm0, %v300_v55 }
 0x2b2   : > { %1025 = vmatprep.subr.msk.bf16.mxu1 %vm134_vm0, %v306_v47 }
 0x2b9   : > { %977 = vmatpush3.bf16.xpose.msra.mxu1 %v317_v56 }
 0x2c0   : > { %979 = vmatmul.mubr.msk.bf16.vlgmr.msra.gmra.mrb[4].mxu1 %vm134_vm0, %v302_v57 }
 0x383   : > { %v1192_v58 = vpop.f32.mrb[0].mxu1 }
 0x384   : > { %v1194_v59 = vpop.f32.mrb[1].mxu1 }
 0x385   : > { %v973_v60 = vpop.f32.mrb[2].mxu1 }
 0x386   : > { %v1196_v61 = vpop.f32.mrb[3].mxu1 }
 0x393   : > { %v980_v62 = vpop.f32.mrb[4].mxu1 }
 0x394   : > { %v353_v63 = vpop.f32.mrb[5].mxu1  ;;  %v373_v5 = vsel %vm202_vm1, %v980_v62, -inf }
 0x395   : > { %v981_v0 = vpop.f32.mrb[6].mxu1  ;;  %v367_v1 = vsel %vm195_vm2, %v353_v63, -inf }
 0x396   : > { %368 = vmax.xlane.f32.xlu1 %v367_v1  ;;  %v356_v2 = vpop.f32.mrb[7].mxu1 }
 0x397   : > { %v370_v4 = vsel %vm195_vm2, %v356_v2, -inf }
 0x398   : > { %371 = vmax.xlane.f32.xlu0 %v370_v4 }
 0x39a   : > { %374 = vmax.xlane.f32.xlu1 %v373_v5 }
 0x3ab   : > { %402 = vrot.lane.b32.xlu1 %v1151_v3, %s1115_s16 }
 0x423   : > { %v369_v8 = vpop.xlane.xlu1 %368 }
 0x424   : > { %v376_v10 = vsub.f32 %v353_v63, %v369_v8 }
 0x425   : > { %v372_v9 = vpop.xlane.xlu0 %371 }
 0x426   : > { %v377_v11 = vsub.f32 %v356_v2, %v372_v9  ;;  %v379_v16 = vmul.f32 1.442695, %v376_v10 }
 0x427   : > { %v375_v12 = vpop.xlane.xlu1 %374 }
 0x428   : > { %v381_v14 = vmul.f32 1.442695, %v377_v11  ;;  %v378_v15 = vsub.f32 %v980_v62, %v375_v12 }
 0x42a   : > { %1066 = vpow2.f32 %v381_v14  ;;  %v383_v17 = vmul.f32 1.442695, %v378_v15 }
 0x42b   : > { %v403_v18 = vpop.permute.xlu1 %402 }
 0x42c   : > { %1068 = vpow2.f32 %v383_v17  ;;  %982 = vmatprep.subr.bf16.mxu0 %v403_v18 }
 0x42d   : > { %983 = vmatpush3.bf16.msra.mxu0 %v403_v18  ;;  %1070 = vpow2.f32 %v379_v16 }
 0x434   : > { %v1067_v19 = vpop.eup %1066 }
 0x435   : > { %v388_v20 = vsel %vm195_vm2, %v1067_v19, 0.0 }
 0x436   : > { %v1069_v21 = vpop.eup %1068  ;;  %389 = vadd.xlane.f32.xlu1 %v388_v20 }
 0x437   : > { %v391_v22 = vsel %vm202_vm1, %v1069_v21, 0.0  ;;  %v1071_v23 = vpop.eup %1070 }
 0x438   : > { %392 = vadd.xlane.f32.xlu0 %v391_v22  ;;  %v385_v24 = vsel %vm195_vm2, %v1071_v23, 0.0 }
 0x43c   : > { %386 = vadd.xlane.f32.xlu0 %v385_v24 }
 0x447   : > { %468 = vrot.lane.b32.xlu1 %v1151_v3, %s1116_s17 }
 0x44b   : > { %470 = vrot.lane.b32.xlu1 %v1154_v6, %s1116_s17 }
 0x44f   : > { %466 = vrot.lane.b32.xlu1 %v1165_v13, %s1117_s18 }
 0x452   : > { %404 = vrot.lane.b32.xlu0 %v1154_v6, %s1115_s16 }
 0x456   : > { %464 = vrot.lane.b32.xlu0 %v1156_v7, %s1117_s18 }
 0x4c3   : > { %v390_v25 = vpop.xlane.xlu1 %389 }
 0x4c5   : > { %v393_v26 = vpop.xlane.xlu0 %392 }
 0x4c6   : > { %1072 = vrcp.f32 %v393_v26 }
 0x4c7   : > { %1074 = vrcp.f32 %v390_v25  ;;  %v469_v30 = vpop.permute.xlu1 %468 }
 0x4c8   : > { %v479_v38 = vsel %vm134_vm0, %v469_v30, 0 }
 0x4c9   : > { %v387_v27 = vpop.xlane.xlu0 %386 }
 0x4ca   : > { %1076 = vrcp.f32 %v387_v27 }
 0x4cb   : > { %v471_v42 = vpop.permute.xlu1 %470 }
 0x4cc   : > { %v482_v43 = vsel %vm134_vm0, %v471_v42, 0 }
 0x4cd   : > { %v405_v28 = vpop.permute.xlu0 %404 }
 0x4ce   : > { %v414_v29 = vand.u32 %v405_v28, %v1181_v41 }
 0x4cf   : > { %v467_v44 = vpop.permute.xlu1 %466 }
 0x4d0   : > { %984 = vmatprep.subr.bf16.mxu0 %v414_v29  ;;  %v1073_v31 = vpop.eup %1072 }
 0x4d1   : > { %985 = vmatpush3.bf16.msra.mxu0 %v414_v29  ;;  %v1075_v32 = vpop.eup %1074  ;;  %v399_v34 = vmul.f32 %v1073_v31, %v1069_v21  ;;  %v465_v40 = vpop.permute.xlu0 %464 }
 0x4d2   : > { %1026 = vmatprep.subr.msk.bf16.mxu0 %vm134_vm0, %v469_v30  ;;  %v398_v36 = vmul.f32 %v1075_v32, %v1067_v19 }
 0x4d3   : > { %v401_v39 = vpack.c.bf16 %v399_v34, %v399_v34 }
 0x4d4   : > { %v1077_v33 = vpop.eup %1076 }
 0x4d5   : > { %v397_v35 = vmul.f32 %v1077_v33, %v1071_v23 }
 0x4d7   : > { %v400_v37 = vpack.c.bf16 %v398_v36, %v397_v35 }
 0x4d9   : > { %986 = vmatprep.mubr.msk.bf16.mxu0 %vm195_vm2, %v400_v37 }
 0x4da   : > { %987 = vmatmul.mubr.msk.bf16.vlgmr.msra.gmra.mrb[4].mxu0 %vm195_vm2, %v401_v39 }
 0x4db   : > { %991 = vmatpush3.bf16.xpose.msra.mxu0 %v479_v38  ;;  %994 = vmatprep.mubr.msk.bf16.mxu0 %vm134_vm0, %v465_v40 }
 0x4dc   : > { %1027 = vmatprep.subr.msk.bf16.mxu0 %vm134_vm0, %v471_v42 }
 0x4e3   : > { %993 = vmatpush3.bf16.xpose.msra.mxu0 %v482_v43 }
 0x4ea   : > { %995 = vmatmul.mubr.msk.bf16.vlgmr.msra.gmra.mrb[8].mxu0 %vm134_vm0, %v467_v44 }
 0x5ad   : > { %v1221_v45 = vpop.f32.mrb[4].mxu0 }
 0x5ae   : > { %v1223_v46 = vpop.f32.mrb[5].mxu0 }
 0x5af   : > { %v989_v47 = vpop.f32.mrb[6].mxu0 }
 0x5b0   : > { %v1225_v48 = vpop.f32.mrb[7].mxu0 }
 0x5bd   : > { %v996_v49 = vpop.f32.mrb[8].mxu0 }
 0x5be   : > { %v518_v50 = vpop.f32.mrb[9].mxu0  ;;  %v538_v55 = vsel %vm202_vm1, %v996_v49, -inf }
 0x5bf   : > { %v997_v51 = vpop.f32.mrb[10].mxu0  ;;  %v532_v52 = vsel %vm195_vm2, %v518_v50, -inf }
 0x5c0   : > { %533 = vmax.xlane.f32.xlu0 %v532_v52  ;;  %v521_v53 = vpop.f32.mrb[11].mxu0 }
 0x5c1   : > { %v535_v54 = vsel %vm195_vm2, %v521_v53, -inf }
 0x5c2   : > { %536 = vmax.xlane.f32.xlu1 %v535_v54 }
 0x5c4   : > { %539 = vmax.xlane.f32.xlu0 %v538_v55 }
 0x5d3   : > { %567 = vrot.lane.b32.xlu1 %v1151_v3, %s1118_s19 }
 0x64d   : > { %v534_v56 = vpop.xlane.xlu0 %533 }
 0x64e   : > { %v541_v60 = vsub.f32 %v518_v50, %v534_v56 }
 0x64f   : > { %v537_v57 = vpop.xlane.xlu1 %536 }
 0x650   : > { %v542_v62 = vsub.f32 %v521_v53, %v537_v57  ;;  %v544_v4 = vmul.f32 1.442695, %v541_v60 }
 0x651   : > { %v540_v63 = vpop.xlane.xlu0 %539 }
 0x652   : > { %v546_v0 = vmul.f32 1.442695, %v542_v62  ;;  %v543_v1 = vsub.f32 %v996_v49, %v540_v63 }
 0x653   : > { %v568_v2 = vpop.permute.xlu1 %567 }
 0x654   : > { %1078 = vpow2.f32 %v546_v0  ;;  %v548_v5 = vmul.f32 1.442695, %v543_v1  ;;  %998 = vmatprep.subr.bf16.mxu1 %v568_v2 }
 0x655   : > { %999 = vmatpush3.bf16.msra.mxu1 %v568_v2 }
 0x656   : > { %1080 = vpow2.f32 %v548_v5 }
 0x657   : > { %1082 = vpow2.f32 %v544_v4 }
 0x65e   : > { %v1079_v8 = vpop.eup %1078 }
 0x65f   : > { %v553_v9 = vsel %vm195_vm2, %v1079_v8, 0.0 }
 0x660   : > { %v1081_v10 = vpop.eup %1080  ;;  %554 = vadd.xlane.f32.xlu1 %v553_v9 }
 0x661   : > { %v556_v11 = vsel %vm202_vm1, %v1081_v10, 0.0  ;;  %v1083_v12 = vpop.eup %1082 }
 0x662   : > { %557 = vadd.xlane.f32.xlu0 %v556_v11  ;;  %v550_v14 = vsel %vm195_vm2, %v1083_v12, 0.0 }
 0x666   : > { %551 = vadd.xlane.f32.xlu0 %v550_v14 }
 0x671   : > { %633 = vrot.lane.b32.xlu1 %v1151_v3, %s1119_s20 }
 0x675   : > { %635 = vrot.lane.b32.xlu1 %v1154_v6, %s1119_s20 }
 0x679   : > { %631 = vrot.lane.b32.xlu1 %v1165_v13, %s1120_s21 }
 0x67c   : > { %569 = vrot.lane.b32.xlu0 %v1154_v6, %s1118_s19 }
 0x680   : > { %629 = vrot.lane.b32.xlu0 %v1156_v7, %s1120_s21 }
 0x6ed   : > { %v555_v15 = vpop.xlane.xlu1 %554 }
 0x6ef   : > { %v558_v16 = vpop.xlane.xlu0 %557 }
 0x6f0   : > { %1084 = vrcp.f32 %v558_v16 }
 0x6f1   : > { %1086 = vrcp.f32 %v555_v15  ;;  %v634_v20 = vpop.permute.xlu1 %633 }
 0x6f2   : > { %v644_v26 = vsel %vm134_vm0, %v634_v20, 0 }
 0x6f3   : > { %v552_v17 = vpop.xlane.xlu0 %551 }
 0x6f4   : > { %1088 = vrcp.f32 %v552_v17 }
 0x6f5   : > { %v636_v29 = vpop.permute.xlu1 %635 }
 0x6f6   : > { %v647_v30 = vsel %vm134_vm0, %v636_v29, 0 }
 0x6f7   : > { %v570_v18 = vpop.permute.xlu0 %569 }
 0x6f8   : > { %v579_v19 = vand.u32 %v570_v18, %v1181_v41 }
 0x6f9   : > { %v632_v31 = vpop.permute.xlu1 %631 }
 0x6fa   : > { %1000 = vmatprep.subr.bf16.mxu1 %v579_v19  ;;  %v1085_v21 = vpop.eup %1084 }
 0x6fb   : > { %1001 = vmatpush3.bf16.msra.mxu1 %v579_v19  ;;  %v1087_v22 = vpop.eup %1086  ;;  %v564_v23 = vmul.f32 %v1085_v21, %v1081_v10  ;;  %v630_v28 = vpop.permute.xlu0 %629 }
 0x6fc   : > { %1028 = vmatprep.subr.msk.bf16.mxu1 %vm134_vm0, %v634_v20  ;;  %v563_v7 = vmul.f32 %v1087_v22, %v1079_v8 }
 0x6fd   : > { %v566_v27 = vpack.c.bf16 %v564_v23, %v564_v23 }
 0x6fe   : > { %v1089_v13 = vpop.eup %1088 }
 0x6ff   : > { %v562_v24 = vmul.f32 %v1089_v13, %v1083_v12 }
 0x701   : > { %v565_v25 = vpack.c.bf16 %v563_v7, %v562_v24 }
 0x703   : > { %1002 = vmatprep.mubr.msk.bf16.mxu1 %vm195_vm2, %v565_v25 }
 0x704   : > { %1003 = vmatmul.mubr.msk.bf16.vlgmr.msra.gmra.mrb[8].mxu1 %vm195_vm2, %v566_v27 }
 0x705   : > { %1007 = vmatpush3.bf16.xpose.msra.mxu1 %v644_v26  ;;  %1010 = vmatprep.mubr.msk.bf16.mxu1 %vm134_vm0, %v630_v28 }
 0x706   : > { %1029 = vmatprep.subr.msk.bf16.mxu1 %vm134_vm0, %v636_v29 }
 0x70d   : > { %1009 = vmatpush3.bf16.xpose.msra.mxu1 %v647_v30 }
 0x714   : > { %1011 = vmatmul.mubr.msk.bf16.vlgmr.msra.gmra.mrb[12].mxu1 %vm134_vm0, %v632_v31 }
 0x7d7   : > { %v1004_v32 = vpop.f32.mrb[8].mxu1 }
 0x7d8   : > { %v615_v33 = vpop.f32.mrb[9].mxu1 }
 0x7d9   : > { %v1005_v34 = vpop.f32.mrb[10].mxu1 }
 0x7da   : > { %v618_v35 = vpop.f32.mrb[11].mxu1 }
 0x7e7   : > { %v1012_v36 = vpop.f32.mrb[12].mxu1 }
 0x7e8   : > { %v683_v37 = vpop.f32.mrb[13].mxu1  ;;  %v703_v43 = vsel %vm202_vm1, %v1012_v36, -inf }
 0x7e9   : > { %v1013_v38 = vpop.f32.mrb[14].mxu1  ;;  %v697_v39 = vsel %vm195_vm2, %v683_v37, -inf }
 0x7ea   : > { %698 = vmax.xlane.f32.xlu0 %v697_v39  ;;  %v686_v40 = vpop.f32.mrb[15].mxu1 }
 0x7eb   : > { %v700_v42 = vsel %vm195_vm2, %v686_v40, -inf }
 0x7ec   : > { %701 = vmax.xlane.f32.xlu1 %v700_v42 }
 0x7ee   : > { %704 = vmax.xlane.f32.xlu0 %v703_v43 }
 0x877   : > { %v699_v44 = vpop.xlane.xlu0 %698 }
 0x878   : > { %v706_v49 = vsub.f32 %v683_v37, %v699_v44 }
 0x879   : > { %v702_v47 = vpop.xlane.xlu1 %701 }
 0x87a   : > { %v707_v50 = vsub.f32 %v686_v40, %v702_v47  ;;  %v709_v54 = vmul.f32 1.442695, %v706_v49 }
 0x87b   : > { %v705_v51 = vpop.xlane.xlu0 %704 }
 0x87c   : > { %v711_v52 = vmul.f32 1.442695, %v707_v50  ;;  %v708_v53 = vsub.f32 %v1012_v36, %v705_v51 }
 0x87e   : > { %1090 = vpow2.f32 %v711_v52  ;;  %v713_v55 = vmul.f32 1.442695, %v708_v53 }
 0x880   : > { %1092 = vpow2.f32 %v713_v55 }
 0x881   : > { %1094 = vpow2.f32 %v709_v54 }
 0x888   : > { %v1091_v56 = vpop.eup %1090 }
 0x889   : > { %v718_v57 = vsel %vm195_vm2, %v1091_v56, 0.0 }
 0x88a   : > { %v1093_v60 = vpop.eup %1092  ;;  %719 = vadd.xlane.f32.xlu1 %v718_v57 }
 0x88b   : > { %v721_v62 = vsel %vm202_vm1, %v1093_v60, 0.0  ;;  %v1095_v63 = vpop.eup %1094 }
 0x88c   : > { %722 = vadd.xlane.f32.xlu0 %v721_v62  ;;  %v715_v0 = vsel %vm195_vm2, %v1095_v63, 0.0 }
 0x890   : > { %716 = vadd.xlane.f32.xlu0 %v715_v0 }
 0x89b   : > { %732 = vrot.lane.b32.xlu1 %v1151_v3, %s1121_s22 }
 0x89f   : > { %797 = vrot.lane.b32.xlu1 %v1223_v46, %s1122_s23 }
 0x8a3   : > { %799 = vrot.lane.b32.xlu1 %v1225_v48, %s1122_s23 }
 0x8a6   : > { %734 = vrot.lane.b32.xlu0 %v1154_v6, %s1121_s22 }
 0x8a7   : > { %809 = vrot.lane.b32.xlu1 %v615_v33, %s1123_s24 }
 0x8aa   : > { %801 = vrot.lane.b32.xlu0 %v1221_v45, %s1122_s23 }
 0x8ab   : > { %813 = vrot.lane.b32.xlu1 %v1004_v32, %s1123_s24 }
 0x8ae   : > { %811 = vrot.lane.b32.xlu0 %v618_v35, %s1123_s24 }
 0x917   : > { %v720_v1 = vpop.xlane.xlu1 %719 }
 0x919   : > { %v723_v2 = vpop.xlane.xlu0 %722 }
 0x91a   : > { %1096 = vrcp.f32 %v723_v2 }
 0x91b   : > { %v733_v4 = vpop.permute.xlu1 %732  ;;  %1098 = vrcp.f32 %v720_v1 }
 0x91c   : > { %1014 = vmatprep.subr.bf16.mxu0 %v733_v4 }
 0x91d   : > { %v717_v3 = vpop.xlane.xlu0 %716  ;;  %1015 = vmatpush3.bf16.msra.mxu0 %v733_v4 }
 0x91e   : > { %1100 = vrcp.f32 %v717_v3 }
 0x91f   : > { %v798_v17 = vpop.permute.xlu1 %797 }
 0x920   : > { %v830_v13 = vsel %vm134_vm0, %v1194_v59, %v798_v17 }
 0x921   : > { %v735_v46 = vpop.permute.xlu0 %734 }
 0x922   : > { %v744_v48 = vand.u32 %v735_v46, %v1181_v41 }
 0x923   : > { %v800_v18 = vpop.permute.xlu1 %799 }
 0x924   : > { %1016 = vmatprep.subr.bf16.mxu0 %v744_v48  ;;  %v1097_v6 = vpop.eup %1096  ;;  %v831_v7 = vsel %vm134_vm0, %v1196_v61, %v800_v18 }
 0x925   : > { %1017 = vmatpush3.bf16.msra.mxu0 %v744_v48  ;;  %v1099_v5 = vpop.eup %1098  ;;  %v729_v45 = vmul.f32 %v1097_v6, %v1093_v60  ;;  %v802_v19 = vpop.permute.xlu0 %801 }
 0x926   : > { %v728_v10 = vmul.f32 %v1099_v5, %v1091_v56  ;;  %v832_v59 = vsel %vm134_vm0, %v1192_v58, %v802_v19 }
 0x927   : > { %v731_v12 = vpack.c.bf16 %v729_v45, %v729_v45  ;;  %v810_v20 = vpop.permute.xlu1 %809 }
 0x928   : > { %v1101_v8 = vpop.eup %1100  ;;  %v834_v23 = vsel %vm833_vm4, %v830_v13, %v810_v20 }
 0x929   : > { %v727_v9 = vmul.f32 %v1101_v8, %v1095_v63  ;;  %v812_v21 = vpop.permute.xlu0 %811 }
 0x92a   : > { %v835_v26 = vsel %vm833_vm4, %v831_v7, %v812_v21 }
 0x92b   : > { %v730_v11 = vpack.c.bf16 %v728_v10, %v727_v9  ;;  %v814_v22 = vpop.permute.xlu1 %813 }
 0x92c   : > { %v836_v29 = vsel %vm833_vm4, %v832_v59, %v814_v22 }
 0x92d   : > { %1018 = vmatprep.mubr.msk.bf16.mxu0 %vm195_vm2, %v730_v11 }
 0x92e   : > { %1019 = vmatmul.mubr.msk.bf16.vlgmr.msra.gmra.mrb[12].mxu0 %vm195_vm2, %v731_v12 }
 0xa01   : > { %v1020_v14 = vpop.f32.mrb[12].mxu0 }
 0xa02   : > { %v780_v15 = vpop.f32.mrb[13].mxu0 }
 0xa03   : > { %821 = vrot.lane.b32.xlu0 %v780_v15, %s1124_s25  ;;  %v1021_v41 = vpop.f32.mrb[14].mxu0 }
 0xa04   : > { %v783_v16 = vpop.f32.mrb[15].mxu0 }
 0xa05   : > { %823 = vrot.lane.b32.xlu1 %v783_v16, %s1124_s25 }
 0xa07   : > { %825 = vrot.lane.b32.xlu0 %v1020_v14, %s1124_s25 }
 0xa75   : > { %v822_v24 = vpop.permute.xlu0 %821 }
 0xa76   : > { %v838_v25 = vsel %vm837_vm5, %v834_v23, %v822_v24 }
 0xa77   : > { %842 = vst.msk [vmem:[%s116_s28] sm:$0xff] %vm841_vm6, %v838_v25  ;;  %v824_v27 = vpop.permute.xlu1 %823 }
 0xa78   : > { %v839_v28 = vsel %vm837_vm5, %v835_v26, %v824_v27 }
 0xa79   : > { %843 = vst.msk [vmem:[%s116_s28 + $0x8] sm:$0xff] %vm841_vm6, %v839_v28  ;;  %v826_v30 = vpop.permute.xlu0 %825 }
 0xa7a   : > { %v840_v31 = vsel %vm837_vm5, %v836_v29, %v826_v30 }
 0xa7b   : > { %845 = vst.msk [vmem:[%s116_s28 + $0x10] sm:$0x1] %vm844_vm7, %v840_v31 }
 0xa7c PF: > { %s11_s6 = sadd.s32 1, %s1108_s6  }
 0xa7d   : > { %p8_p4 = scmp.ge.s32.totalorder %s11_s6, 4  }
 0xa7f   :  { %10 = sbr.rel (!%p8_p4) target bundleno = 1 (0x1), region = 54 }

// kernel: encode_image.17
= control target key start
LH: loop header
LB: loop body
LE: loop exit
PB: predicated region body
PF: predicated region fallthrough
CT: control target
= control target key end

     0   :  { %v170_v0 = vmov 0.0   ;;  %vm171_vm0 = vmmov 0   ;;  %vm49_vm1 = vcmask 261120   ;;  %vm129_vm2 = vcmask 254976   ;;  %s261_s1 = inlined_call_operand.vmem [shape: bf16[32,32], index: 1, kind: input, shape index: {}]   ;;  %s262_s0 = inlined_call_operand.vmem [shape: f32[34,32], index: 0, kind: input, shape index: {}]   ;;  %s263_s2 = inlined_call_operand.vmem [shape: f32[1,32], index: 2, kind: input, shape index: {}]   ;;  %s264_s3 = inlined_call_operand.vmem [shape: f32[34,32], index: 3, kind: input, shape index: {}]   ;;  %s265_s4 = inlined_call_operand.vmem [shape: f32[34,32], index: 4, kind: output, shape index: {}]  }
   0x1   :  { %162 = vmatprep.subr.bf16.mxu1 %v170_v0  ;;  %v168_v1 = vld [vmem:[%s261_s1] sm:$0xff]   ;;  %146 = vmatprep.subr.bf16.mxu0 %v170_v0  ;;  %v169_v2 = vld [vmem:[%s261_s1 + $0x8] sm:$0xff]   ;;  %v20_v3 = vld [vmem:[%s262_s0 + $0x10] sm:$0xff] }
   0x2   :  { %154 = vmatprep.mubr.msk.bf16.mxu1 %vm171_vm0, %v170_v0  ;;  %150 = vmatprep.mubr.msk.bf16.mxu0 %vm171_vm0, %v170_v0  ;;  %v21_v4 = vld [vmem:[%s262_s0 + $0x18] sm:$0xff]  ;;  %v18_v5 = vld [vmem:[%s262_s0] sm:$0xff]  ;;  %v19_v6 = vld [vmem:[%s262_s0 + $0x8] sm:$0xff] }
   0x3   :  { %164 = vmatpush3.bf16.msra.mxu1 %v168_v1  ;;  %147 = vmatpush3.bf16.msra.mxu0 %v168_v1  ;;  %v24_v7 = vpack.c.bf16 %v21_v4, %v20_v3  ;;  %v23_v8 = vpack.c.bf16 %v19_v6, %v18_v5  ;;  %v22_v9 = vld [vmem:[%s262_s0 + $0x20] sm:$0x3]  ;;  %v117_v13 = vld [vmem:[%s264_s3 + $0x10] sm:$0xff]  ;;  %v118_v21 = vld [vmem:[%s264_s3 + $0x18] sm:$0xff] }
   0x4   :  { %163 = vmatprep.subr.bf16.mxu1 %v170_v0  ;;  %148 = vmatprep.subr.bf16.mxu0 %v170_v0  ;;  %v25_v10 = vpack.c.bf16 %v22_v9, %v22_v9  ;;  %v135_v11 = vld [vmem:[%s263_s2] ss:$0 sm:$0xff]  ;;  %v116_v23 = vld [vmem:[%s264_s3 + $0x8] sm:$0xff] }
   0x5   :  { %v115_v15 = vld [vmem:[%s264_s3] sm:$0xff] }
   0x6   :  { %v119_v33 = vld [vmem:[%s264_s3 + $0x20] sm:$0x3] }
   0x7   :  { %165 = vmatpush3.bf16.msra.mxu1 %v169_v2  ;;  %149 = vmatpush3.bf16.msra.mxu0 %v169_v2 }
   0xa   :  { %155 = vmatmul.mubr.msk.bf16.vlgmr.msra.gmra.mrb[0].mxu1 %vm49_vm1, %v24_v7  ;;  %151 = vmatmul.mubr.msk.bf16.vlgmr.msra.gmra.mrb[0].mxu0 %vm49_vm1, %v23_v8 }
   0xb   :  { %158 = vmatprep.mubr.msk.bf16.mxu1 %vm171_vm0, %v170_v0 }
  0x12   :  { %159 = vmatmul.mubr.msk.bf16.gmra.mrb[4].mxu1 %vm49_vm1, %v25_v10 }
  0xdd   :  { %v101_v12 = vpop.f32.mrb[0].mxu1  ;;  %v93_v14 = vpop.f32.mrb[0].mxu0 }
  0xde   :  { %v102_v16 = vadd.f32 %v135_v11, %v101_v12  ;;  %v156_v17 = vpop.f32.mrb[1].mxu1  ;;  %v94_v18 = vadd.f32 %v135_v11, %v93_v14  ;;  %v152_v19 = vpop.f32.mrb[1].mxu0 }
  0xdf   :  { %v104_v20 = vpop.f32.mrb[2].mxu1  ;;  %v96_v22 = vpop.f32.mrb[2].mxu0 }
  0xe0   :  { %v122_v24 = vadd.f32 %v117_v13, %v102_v16  ;;  %v105_v25 = vadd.f32 %v135_v11, %v104_v20  ;;  %v120_v26 = vadd.f32 %v115_v15, %v94_v18  ;;  %v157_v27 = vpop.f32.mrb[3].mxu1  ;;  %v97_v28 = vadd.f32 %v135_v11, %v96_v22  ;;  %v153_v29 = vpop.f32.mrb[3].mxu0 }
  0xe2   :  { %127 = vst.msk [vmem:[%s265_s4 + $0x10] sm:$0xff] %vm49_vm1, %v122_v24  ;;  %v123_v30 = vadd.f32 %v118_v21, %v105_v25  ;;  %125 = vst.msk [vmem:[%s265_s4] sm:$0xff] %vm49_vm1, %v120_v26  ;;  %v121_v31 = vadd.f32 %v116_v23, %v97_v28 }
  0xe4   :  { %128 = vst.msk [vmem:[%s265_s4 + $0x18] sm:$0xff] %vm49_vm1, %v123_v30  ;;  %126 = vst.msk [vmem:[%s265_s4 + $0x8] sm:$0xff] %vm49_vm1, %v121_v31 }
  0xe5   :  { %v109_v32 = vpop.f32.mrb[4].mxu1 }
  0xe6   :  { %v110_v34 = vadd.f32 %v135_v11, %v109_v32  ;;  %v160_v35 = vpop.f32.mrb[5].mxu1 }
  0xe7   :  { %v112_v36 = vpop.f32.mrb[6].mxu1 }
  0xe8   :  { %v124_v37 = vadd.f32 %v119_v33, %v110_v34  ;;  %v161_v38 = vpop.f32.mrb[7].mxu1 }
  0xea   :  { %130 = vst.msk [vmem:[%s265_s4 + $0x20] sm:$0x3] %vm129_vm2, %v124_v37 }

// kernel: encode_image.18
= control target key start
LH: loop header
LB: loop body
LE: loop exit
PB: predicated region body
PF: predicated region fallthrough
CT: control target
= control target key end

     0   :  { %vm26_vm0 = vcmask 261120   ;;  %vm39_vm1 = vcmask 254976   ;;  %v330_v36 = vmov 0.0   ;;  %vm331_vm2 = vmmov 0   ;;  %s438_s0 = inlined_call_operand.vmem [shape: f32[34,32], index: 0, kind: input, shape index: {}]   ;;  %s439_s1 = inlined_call_operand.vmem [shape: bf16[32,128], index: 1, kind: input, shape index: {}]   ;;  %s440_s3 = inlined_call_operand.vmem [shape: f32[1,32], index: 3, kind: input, shape index: {}]   ;;  %s441_s4 = inlined_call_operand.vmem [shape: f32[1,32], index: 4, kind: input, shape index: {}]   ;;  %s442_s2 = inlined_call_operand.vmem [shape: f32[1,128], index: 2, kind: input, shape index: {}]   ;;  %s443_s5 = inlined_call_operand.vmem [shape: f32[34,128], index: 5, kind: output, shape index: {}]  }
   0x1   :  { %v23_v0 = vld [vmem:[%s438_s0 + $0x10] sm:$0xff]  ;;  %v24_v1 = vld [vmem:[%s438_s0 + $0x18] sm:$0xff]  ;;  %v21_v2 = vld [vmem:[%s438_s0] sm:$0xff]  ;;  %292 = vmatprep.subr.bf16.mxu1 %v330_v36  ;;  %276 = vmatprep.subr.bf16.mxu0 %v330_v36 }
   0x2   :  { %v33_v3 = vsel %vm26_vm0, %v23_v0, 0.0  ;;  %v27_v4 = vsel %vm26_vm0, %v21_v2, 0.0  ;;  %v22_v5 = vld [vmem:[%s438_s0 + $0x8] sm:$0xff]  ;;  %v36_v6 = vsel %vm26_vm0, %v24_v1, 0.0  ;;  %v25_v8 = vld [vmem:[%s438_s0 + $0x20] sm:$0x3]  ;;  %284 = vmatprep.mubr.msk.bf16.mxu1 %vm331_vm2, %v330_v36  ;;  %280 = vmatprep.mubr.msk.bf16.mxu0 %vm331_vm2, %v330_v36 }
   0x3   :  { %34 = vadd.xlane.f32.xlu0 %v33_v3  ;;  %28 = vadd.xlane.f32.xlu1 %v27_v4  ;;  %v30_v7 = vsel %vm26_vm0, %v22_v5, 0.0  ;;  %v40_v9 = vsel %vm39_vm1, %v25_v8, 0.0  ;;  %v298_v35 = vld [vmem:[%s439_s1] sm:$0xff]   ;;  %v299_v37 = vld [vmem:[%s439_s1 + $0x8] sm:$0xff]  }
   0x4   :  { %294 = vmatpush3.bf16.msra.mxu1 %v298_v35  ;;  %277 = vmatpush3.bf16.msra.mxu0 %v298_v35  ;;  %v258_v55 = vld [vmem:[%s440_s3] ss:$0 sm:$0xff] }
   0x5   :  { %293 = vmatprep.subr.bf16.mxu1 %v330_v36  ;;  %278 = vmatprep.subr.bf16.mxu0 %v330_v36  ;;  %v259_v61 = vld [vmem:[%s441_s4] ss:$0 sm:$0xff] }
   0x7   :  { %37 = vadd.xlane.f32.xlu0 %v36_v6  ;;  %31 = vadd.xlane.f32.xlu1 %v30_v7 }
   0x8   :  { %295 = vmatpush3.bf16.msra.mxu1 %v299_v37  ;;  %279 = vmatpush3.bf16.msra.mxu0 %v299_v37 }
   0xb   :  { %41 = vadd.xlane.f32.xlu0 %v40_v9 }
  0x90   :  { %v35_v10 = vpop.xlane.xlu0 %34  ;;  %v29_v11 = vpop.xlane.xlu1 %28 }
  0x91   :  { %v46_v12 = vmul.f32 0.03125, %v35_v10  ;;  %v44_v13 = vmul.f32 0.03125, %v29_v11 }
  0x93   :  { %v382_v14 = vsub.f32 %v23_v0, %v46_v12  ;;  %v384_v15 = vsub.f32 %v21_v2, %v44_v13 }
  0x94   :  { %v38_v16 = vpop.xlane.xlu0 %37  ;;  %v32_v17 = vpop.xlane.xlu1 %31 }
  0x95   :  { %v47_v18 = vmul.f32 0.03125, %v38_v16  ;;  %v56_v19 = vmul.f32 %v382_v14, %v382_v14  ;;  %v45_v20 = vmul.f32 0.03125, %v32_v17  ;;  %v54_v21 = vmul.f32 %v384_v15, %v384_v15 }
  0x97   :  { %v52_v22 = vsub.f32 %v24_v1, %v47_v18  ;;  %v65_v23 = vsel %vm26_vm0, %v56_v19, 0.0  ;;  %v391_v24 = vsub.f32 %v22_v5, %v45_v20  ;;  %v59_v28 = vsel %vm26_vm0, %v54_v21, 0.0 }
  0x98   :  { %v42_v25 = vpop.xlane.xlu0 %41  ;;  %66 = vadd.xlane.f32.xlu1 %v65_v23 }
  0x99   :  { %v48_v26 = vmul.f32 0.03125, %v42_v25  ;;  %v57_v27 = vmul.f32 %v52_v22, %v52_v22  ;;  %v55_v29 = vmul.f32 %v391_v24, %v391_v24 }
  0x9b   :  { %v53_v30 = vsub.f32 %v25_v8, %v48_v26  ;;  %v68_v31 = vsel %vm26_vm0, %v57_v27, 0.0  ;;  %v62_v33 = vsel %vm26_vm0, %v55_v29, 0.0 }
  0x9c   :  { %69 = vadd.xlane.f32.xlu0 %v68_v31  ;;  %60 = vadd.xlane.f32.xlu1 %v59_v28 }
  0x9d   :  { %v58_v32 = vmul.f32 %v53_v30, %v53_v30 }
  0x9f   :  { %v71_v34 = vsel %vm39_vm1, %v58_v32, 0.0 }
  0xa0   :  { %72 = vadd.xlane.f32.xlu1 %v71_v34  ;;  %63 = vadd.xlane.f32.xlu0 %v62_v33 }
 0x125   :  { %v67_v38 = vpop.xlane.xlu1 %66 }
 0x126   :  { %v76_v39 = vmul.f32 0.03125, %v67_v38 }
 0x128   :  { %v81_v40 = vadd.f32 1e-05, %v76_v39 }
 0x129   :  { %v70_v41 = vpop.xlane.xlu0 %69  ;;  %v61_v42 = vpop.xlane.xlu1 %60 }
 0x12a   :  { %300 = vrsqrt.f32 %v81_v40  ;;  %v77_v43 = vmul.f32 0.03125, %v70_v41  ;;  %v74_v44 = vmul.f32 0.03125, %v61_v42 }
 0x12c   :  { %v82_v45 = vadd.f32 1e-05, %v77_v43  ;;  %v79_v46 = vadd.f32 1e-05, %v74_v44 }
 0x12d   :  { %v64_v47 = vpop.xlane.xlu0 %63  ;;  %v73_v48 = vpop.xlane.xlu1 %72 }
 0x12e   :  { %302 = vrsqrt.f32 %v82_v45  ;;  %v75_v49 = vmul.f32 0.03125, %v64_v47  ;;  %v78_v50 = vmul.f32 0.03125, %v73_v48 }
 0x12f   :  { %304 = vrsqrt.f32 %v79_v46 }
 0x130   :  { %v80_v51 = vadd.f32 1e-05, %v75_v49  ;;  %v83_v52 = vadd.f32 1e-05, %v78_v50 }
 0x132   :  { %306 = vrsqrt.f32 %v80_v51 }
 0x133   :  { %308 = vrsqrt.f32 %v83_v52 }
 0x134   :  { %v301_v53 = vpop.eup %300 }
 0x135   :  { %v91_v54 = vmul.f32 %v301_v53, %v382_v14  ;;  %v260_v14 = vld [vmem:[%s442_s2] ss:$0 sm:$0xff] }
 0x137   :  { %v103_v59 = vmul.f32 %v258_v55, %v91_v54 }
 0x138   :  { %v303_v56 = vpop.eup %302 }
 0x139   :  { %v305_v57 = vpop.eup %304  ;;  %v92_v58 = vmul.f32 %v303_v56, %v52_v22  ;;  %v115_v2 = vadd.f32 %v259_v61, %v103_v59 }
 0x13a   :  { %v89_v60 = vmul.f32 %v305_v57, %v384_v15 }
 0x13b   :  { %v104_v62 = vmul.f32 %v258_v55, %v92_v58 }
 0x13c   :  { %v307_v63 = vpop.eup %306  ;;  %v101_v4 = vmul.f32 %v258_v55, %v89_v60 }
 0x13d   :  { %v309_v0 = vpop.eup %308  ;;  %v90_v1 = vmul.f32 %v307_v63, %v391_v24  ;;  %v116_v3 = vadd.f32 %v259_v61, %v104_v62 }
 0x13e   :  { %v93_v5 = vmul.f32 %v309_v0, %v53_v30  ;;  %v113_v9 = vadd.f32 %v259_v61, %v101_v4 }
 0x13f   :  { %v119_v6 = vpack.c.bf16 %v116_v3, %v115_v2  ;;  %v102_v7 = vmul.f32 %v258_v55, %v90_v1 }
 0x140   :  { %v105_v8 = vmul.f32 %v258_v55, %v93_v5 }
 0x141   :  { %285 = vmatmul.mubr.msk.bf16.vlgmr.msra.gmra.mrb[0].mxu1 %vm26_vm0, %v119_v6  ;;  %v114_v10 = vadd.f32 %v259_v61, %v102_v7 }
 0x142   :  { %288 = vmatprep.mubr.msk.bf16.mxu1 %vm331_vm2, %v330_v36  ;;  %v117_v12 = vadd.f32 %v259_v61, %v105_v8 }
 0x143   :  { %v118_v11 = vpack.c.bf16 %v114_v10, %v113_v9 }
 0x144   :  { %v120_v13 = vpack.c.bf16 %v117_v12, %v117_v12 }
 0x145   :  { %281 = vmatmul.mubr.msk.bf16.vlgmr.msra.gmra.mrb[0].mxu0 %vm26_vm0, %v118_v11 }
 0x149   :  { %289 = vmatmul.mubr.msk.bf16.gmra.mrb[4].mxu1 %vm26_vm0, %v120_v13 }
 0x214   :  { %v195_v15 = vpop.f32.mrb[0].mxu1 }
 0x215   :  { %v196_v16 = vadd.f32 %v260_v14, %v195_v15  ;;  %v286_v17 = vpop.f32.mrb[1].mxu1 }
 0x216   :  { %v198_v18 = vpop.f32.mrb[2].mxu1 }
 0x217   :  { %v268_v19 = vmul.f32 -1.702, %v196_v16  ;;  %v199_v20 = vadd.f32 %v260_v14, %v198_v18  ;;  %v287_v21 = vpop.f32.mrb[3].mxu1 }
 0x218   :  { %v187_v22 = vpop.f32.mrb[0].mxu0 }
 0x219   :  { %v223_v23 = vmul.f32 1.442695, %v268_v19  ;;  %v269_v24 = vmul.f32 -1.702, %v199_v20  ;;  %v188_v25 = vadd.f32 %v260_v14, %v187_v22  ;;  %v282_v26 = vpop.f32.mrb[1].mxu0 }
 0x21a   :  { %v190_v27 = vpop.f32.mrb[2].mxu0 }
 0x21b   :  { %310 = vpow2.f32 %v223_v23  ;;  %v225_v28 = vmul.f32 1.442695, %v269_v24  ;;  %v266_v29 = vmul.f32 -1.702, %v188_v25  ;;  %v191_v30 = vadd.f32 %v260_v14, %v190_v27  ;;  %v283_v31 = vpop.f32.mrb[3].mxu0 }
 0x21c   :  { %v203_v32 = vpop.f32.mrb[4].mxu1 }
 0x21d   :  { %312 = vpow2.f32 %v225_v28  ;;  %v219_v33 = vmul.f32 1.442695, %v266_v29  ;;  %v267_v34 = vmul.f32 -1.702, %v191_v30  ;;  %v204_v35 = vadd.f32 %v260_v14, %v203_v32  ;;  %v290_v36 = vpop.f32.mrb[5].mxu1 }
 0x21e   :  { %v206_v37 = vpop.f32.mrb[6].mxu1 }
 0x21f   :  { %314 = vpow2.f32 %v219_v33  ;;  %v221_v38 = vmul.f32 1.442695, %v267_v34  ;;  %v270_v39 = vmul.f32 -1.702, %v204_v35  ;;  %v291_v40 = vpop.f32.mrb[7].mxu1 }
 0x221   :  { %316 = vpow2.f32 %v221_v38  ;;  %v227_v41 = vmul.f32 1.442695, %v270_v39 }
 0x223   :  { %318 = vpow2.f32 %v227_v41 }
 0x225   :  { %v311_v42 = vpop.eup %310 }
 0x226   :  { %v231_v43 = vadd.f32 1.0, %v311_v42 }
 0x227   :  { %v313_v44 = vpop.eup %312 }
 0x228   :  { %320 = vrcp.f32 %v231_v43  ;;  %v232_v45 = vadd.f32 1.0, %v313_v44 }
 0x229   :  { %v315_v46 = vpop.eup %314 }
 0x22a   :  { %322 = vrcp.f32 %v232_v45  ;;  %v229_v47 = vadd.f32 1.0, %v315_v46 }
 0x22b   :  { %v317_v48 = vpop.eup %316 }
 0x22c   :  { %324 = vrcp.f32 %v229_v47  ;;  %v230_v49 = vadd.f32 1.0, %v317_v48 }
 0x22d   :  { %v319_v50 = vpop.eup %318 }
 0x22e   :  { %326 = vrcp.f32 %v230_v49  ;;  %v233_v51 = vadd.f32 1.0, %v319_v50 }
 0x230   :  { %328 = vrcp.f32 %v233_v51 }
 0x232   :  { %v321_v52 = vpop.eup %320 }
 0x233   :  { %v246_v53 = vmul.f32 %v321_v52, %v196_v16 }
 0x234   :  { %v323_v54 = vpop.eup %322 }
 0x235   :  { %251 = vst [vmem:[%s443_s5 + $0x10] sm:$0xff] %v246_v53  ;;  %v247_v55 = vmul.f32 %v323_v54, %v199_v20 }
 0x236   :  { %v325_v56 = vpop.eup %324 }
 0x237   :  { %252 = vst [vmem:[%s443_s5 + $0x18] sm:$0xff] %v247_v55  ;;  %v244_v57 = vmul.f32 %v325_v56, %v188_v25 }
 0x238   :  { %v327_v58 = vpop.eup %326 }
 0x239   :  { %249 = vst [vmem:[%s443_s5] sm:$0xff] %v244_v57  ;;  %v245_v59 = vmul.f32 %v327_v58, %v191_v30 }
 0x23a   :  { %v329_v60 = vpop.eup %328 }
 0x23b   :  { %250 = vst [vmem:[%s443_s5 + $0x8] sm:$0xff] %v245_v59  ;;  %v248_v61 = vmul.f32 %v329_v60, %v204_v35 }
 0x23d   :  { %253 = vst [vmem:[%s443_s5 + $0x20] sm:$0x3] %v248_v61 }

// kernel: encode_image.19
= control target key start
LH: loop header
LB: loop body
LE: loop exit
PB: predicated region body
PF: predicated region fallthrough
CT: control target
= control target key end

     0   :  { %v248_v0 = vmov 0.0   ;;  %vm249_vm0 = vmmov 0   ;;  %vm163_vm1 = vcmask 261120   ;;  %vm168_vm2 = vcmask 254976   ;;  %s354_s1 = inlined_call_operand.vmem [shape: bf16[128,32], index: 1, kind: input, shape index: {}]   ;;  %s355_s0 = inlined_call_operand.vmem [shape: f32[34,128], index: 0, kind: input, shape index: {}]   ;;  %s356_s2 = inlined_call_operand.vmem [shape: f32[1,32], index: 2, kind: input, shape index: {}]   ;;  %s357_s3 = inlined_call_operand.vmem [shape: f32[34,32], index: 3, kind: input, shape index: {}]   ;;  %s358_s4 = inlined_call_operand.vmem [shape: f32[34,32], index: 4, kind: output, shape index: {}]  }
   0x1   :  { %222 = vmatprep.subr.bf16.mxu1 %v248_v0  ;;  %v240_v1 = vld [vmem:[%s354_s1] sm:$0xff]   ;;  %194 = vmatprep.subr.bf16.mxu0 %v248_v0  ;;  %v241_v2 = vld [vmem:[%s354_s1 + $0x8] sm:$0xff]   ;;  %v242_v3 = vld [vmem:[%s354_s1 + $0x10] sm:$0xff]  }
   0x2   :  { %214 = vmatprep.mubr.msk.bf16.mxu1 %vm249_vm0, %v248_v0  ;;  %210 = vmatprep.mubr.msk.bf16.mxu0 %vm249_vm0, %v248_v0  ;;  %v243_v4 = vld [vmem:[%s354_s1 + $0x18] sm:$0xff]   ;;  %v244_v5 = vld [vmem:[%s354_s1 + $0x20] sm:$0xff]   ;;  %v245_v6 = vld [vmem:[%s354_s1 + $0x28] sm:$0xff]  }
   0x3   :  { %230 = vmatpush3.bf16.msra.mxu1 %v240_v1  ;;  %195 = vmatpush3.bf16.msra.mxu0 %v240_v1  ;;  %v246_v7 = vld [vmem:[%s354_s1 + $0x30] sm:$0xff]   ;;  %v247_v8 = vld [vmem:[%s354_s1 + $0x38] sm:$0xff]   ;;  %v18_v11 = vld [vmem:[%s355_s0] sm:$0xff] }
   0x4   :  { %223 = vmatprep.subr.bf16.mxu1 %v248_v0  ;;  %196 = vmatprep.subr.bf16.mxu0 %v248_v0  ;;  %v20_v9 = vld [vmem:[%s355_s0 + $0x10] sm:$0xff]  ;;  %v21_v10 = vld [vmem:[%s355_s0 + $0x18] sm:$0xff]  ;;  %v19_v12 = vld [vmem:[%s355_s0 + $0x8] sm:$0xff] }
   0x5   :  { %v24_v13 = vpack.c.bf16 %v21_v10, %v20_v9  ;;  %v23_v14 = vpack.c.bf16 %v19_v12, %v18_v11  ;;  %v22_v15 = vld [vmem:[%s355_s0 + $0x20] sm:$0x3]  ;;  %v155_v19 = vld [vmem:[%s357_s3 + $0x10] sm:$0xff]  ;;  %v156_v27 = vld [vmem:[%s357_s3 + $0x18] sm:$0xff] }
   0x6   :  { %v25_v16 = vpack.c.bf16 %v22_v15, %v22_v15  ;;  %v174_v17 = vld [vmem:[%s356_s2] ss:$0 sm:$0xff]  ;;  %v154_v29 = vld [vmem:[%s357_s3 + $0x8] sm:$0xff] }
   0x7   :  { %231 = vmatpush3.bf16.msra.mxu1 %v241_v2  ;;  %197 = vmatpush3.bf16.msra.mxu0 %v241_v2  ;;  %v153_v21 = vld [vmem:[%s357_s3] sm:$0xff] }
   0x8   :  { %224 = vmatprep.subr.bf16.mxu1 %v248_v0  ;;  %198 = vmatprep.subr.bf16.mxu0 %v248_v0  ;;  %v157_v39 = vld [vmem:[%s357_s3 + $0x20] sm:$0x3] }
   0xb   :  { %232 = vmatpush3.bf16.msra.mxu1 %v242_v3  ;;  %199 = vmatpush3.bf16.msra.mxu0 %v242_v3 }
   0xc   :  { %225 = vmatprep.subr.bf16.mxu1 %v248_v0  ;;  %200 = vmatprep.subr.bf16.mxu0 %v248_v0 }
   0xf   :  { %233 = vmatpush3.bf16.msra.mxu1 %v243_v4  ;;  %201 = vmatpush3.bf16.msra.mxu0 %v243_v4 }
  0x10   :  { %226 = vmatprep.subr.bf16.mxu1 %v248_v0  ;;  %202 = vmatprep.subr.bf16.mxu0 %v248_v0 }
  0x13   :  { %234 = vmatpush3.bf16.msra.mxu1 %v244_v5  ;;  %203 = vmatpush3.bf16.msra.mxu0 %v244_v5 }
  0x14   :  { %227 = vmatprep.subr.bf16.mxu1 %v248_v0  ;;  %204 = vmatprep.subr.bf16.mxu0 %v248_v0 }
  0x17   :  { %235 = vmatpush3.bf16.msra.mxu1 %v245_v6  ;;  %205 = vmatpush3.bf16.msra.mxu0 %v245_v6 }
  0x18   :  { %228 = vmatprep.subr.bf16.mxu1 %v248_v0  ;;  %206 = vmatprep.subr.bf16.mxu0 %v248_v0 }
  0x1b   :  { %236 = vmatpush3.bf16.msra.mxu1 %v246_v7  ;;  %207 = vmatpush3.bf16.msra.mxu0 %v246_v7 }
  0x1c   :  { %229 = vmatprep.subr.bf16.mxu1 %v248_v0  ;;  %208 = vmatprep.subr.bf16.mxu0 %v248_v0 }
  0x1f   :  { %237 = vmatpush3.bf16.msra.mxu1 %v247_v8  ;;  %209 = vmatpush3.bf16.msra.mxu0 %v247_v8 }
  0x22   :  { %215 = vmatmul.mubr.bf16.vlgmr.msra.gmra.mrb[0].mxu1 %v24_v13  ;;  %211 = vmatmul.mubr.bf16.vlgmr.msra.gmra.mrb[0].mxu0 %v23_v14 }
  0x23   :  { %218 = vmatprep.mubr.msk.bf16.mxu1 %vm249_vm0, %v248_v0 }
  0x2a   :  { %219 = vmatmul.mubr.bf16.gmra.mrb[4].mxu1 %v25_v16 }
  0xf5   :  { %v139_v18 = vpop.f32.mrb[0].mxu1  ;;  %v131_v20 = vpop.f32.mrb[0].mxu0 }
  0xf6   :  { %v140_v22 = vadd.f32 %v174_v17, %v139_v18  ;;  %v216_v23 = vpop.f32.mrb[1].mxu1  ;;  %v132_v24 = vadd.f32 %v174_v17, %v131_v20  ;;  %v212_v25 = vpop.f32.mrb[1].mxu0 }
  0xf7   :  { %v142_v26 = vpop.f32.mrb[2].mxu1  ;;  %v134_v28 = vpop.f32.mrb[2].mxu0 }
  0xf8   :  { %v160_v30 = vadd.f32 %v155_v19, %v140_v22  ;;  %v143_v31 = vadd.f32 %v174_v17, %v142_v26  ;;  %v158_v32 = vadd.f32 %v153_v21, %v132_v24  ;;  %v217_v33 = vpop.f32.mrb[3].mxu1  ;;  %v135_v34 = vadd.f32 %v174_v17, %v134_v28  ;;  %v213_v35 = vpop.f32.mrb[3].mxu0 }
  0xfa   :  { %166 = vst.msk [vmem:[%s358_s4 + $0x10] sm:$0xff] %vm163_vm1, %v160_v30  ;;  %v161_v36 = vadd.f32 %v156_v27, %v143_v31  ;;  %164 = vst.msk [vmem:[%s358_s4] sm:$0xff] %vm163_vm1, %v158_v32  ;;  %v159_v37 = vadd.f32 %v154_v29, %v135_v34 }
  0xfc   :  { %167 = vst.msk [vmem:[%s358_s4 + $0x18] sm:$0xff] %vm163_vm1, %v161_v36  ;;  %165 = vst.msk [vmem:[%s358_s4 + $0x8] sm:$0xff] %vm163_vm1, %v159_v37 }
  0xfd   :  { %v147_v38 = vpop.f32.mrb[4].mxu1 }
  0xfe   :  { %v148_v40 = vadd.f32 %v174_v17, %v147_v38  ;;  %v220_v41 = vpop.f32.mrb[5].mxu1 }
  0xff   :  { %v150_v42 = vpop.f32.mrb[6].mxu1 }
 0x100   :  { %v162_v43 = vadd.f32 %v157_v39, %v148_v40  ;;  %v221_v44 = vpop.f32.mrb[7].mxu1 }
 0x102   :  { %169 = vst.msk [vmem:[%s358_s4 + $0x20] sm:$0x3] %vm168_vm2, %v162_v43 }

// kernel: encode_image.25
= control target key start
LH: loop header
LB: loop body
LE: loop exit
PB: predicated region body
PF: predicated region fallthrough
CT: control target
= control target key end

     0   :  { %vm23_vm0 = vcmask 254976   ;;  %s251_s0 = inlined_call_operand.vmem [shape: f32[2,32], index: 0, kind: input, shape index: {}]   ;;  %s252_s1 = inlined_call_operand.vmem [shape: bf16[32,32], index: 1, kind: input, shape index: {}]   ;;  %s253_s2 = inlined_call_operand.vmem [shape: f32[1,32], index: 2, kind: input, shape index: {}]   ;;  %s254_s3 = inlined_call_operand.vmem [shape: f32[1,32], index: 3, kind: input, shape index: {}]   ;;  %s255_s4 = inlined_call_operand.vmem [shape: f32[1,32], index: 4, kind: input, shape index: {}]   ;;  %s256_s5 = inlined_call_operand.hbm [shape: f32[2,32], index: 5, kind: output, shape index: {}]  }
   0x1   :  { %v22_v0 = vld [vmem:[%s251_s0] sm:$0x3] }
   0x2   :  { %v24_v1 = vsel %vm23_vm0, %v22_v0, 0.0 }
   0x3   :  { %25 = vadd.xlane.f32.xlu0 %v24_v1 }
   0x4   :  { %10 = vsyncpa [#allocation3], 0  ;;  %v157_v7 = vld [vmem:[%s252_s1] sm:$0xff]   ;;  %v185_v8 = vmov 0.0   ;;  %v158_v9 = vld [vmem:[%s252_s1 + $0x8] sm:$0xff]   ;;  %vm186_vm1 = vmmov 0  }
   0x5   :  { %146 = vmatprep.subr.bf16.mxu0 %v185_v8  ;;  %150 = vmatprep.mubr.msk.bf16.mxu0 %vm186_vm1, %v185_v8  ;;  %v137_v14 = vld [vmem:[%s254_s3] ss:$0 sm:$0xff]  ;;  %vm78_vm2 = vcmask 261120   ;;  %s187_s28 = smov [#allocation2]  }
   0x6   :  { %147 = vmatpush3.bf16.msra.mxu0 %v157_v7  ;;  %v138_v16 = vld [vmem:[%s255_s4] ss:$0 sm:$0xff]  ;;  %s129_s29 = sshll.u32 %s187_s28, 4  ;;  %s130_s29 = int_to_ptr.vmem [resolvable:$true] %s129_s29 }
   0x7   :  { %148 = vmatprep.subr.bf16.mxu0 %v185_v8  ;;  %v139_v20 = vld [vmem:[%s253_s2] ss:$0 sm:$0xff]  ;;  %s161_s3 = scalar_lea.vmem %s130_s29, 32  ;;  %p166_p1 = scmp.lt.s32.totalorder %s130_s29, %s130_s29 }
   0x8   :  { %p162_p0 = scmp.ne.s32.totalorder %s130_s29, %s161_s3  ;;  %p167_p2 = scmp.lt.s32.totalorder %s161_s3, %s161_s3 }
   0xa   :  { %149 = vmatpush3.bf16.msra.mxu0 %v158_v9  ;;  %p168_p3 = por %p167_p2, %p166_p1 }
   0xc   :  { %p169_p4 = pnand %p168_p3, %p162_p0 }
  0x90   :  { %v26_v2 = vpop.xlane.xlu0 %25 }
  0x91   :  { %v28_v3 = vmul.f32 0.03125, %v26_v2 }
  0x93   :  { %v29_v4 = vsub.f32 %v22_v0, %v28_v3 }
  0x95   :  { %v30_v5 = vmul.f32 %v29_v4, %v29_v4 }
  0x97   :  { %v31_v6 = vsel %vm23_vm0, %v30_v5, 0.0 }
  0x98   :  { %32 = vadd.xlane.f32.xlu0 %v31_v6 }
 0x125   :  { %v33_v10 = vpop.xlane.xlu0 %32 }
 0x126   :  { %v34_v11 = vmul.f32 0.03125, %v33_v10 }
 0x128   :  { %v35_v12 = vadd.f32 1e-05, %v34_v11 }
 0x12a   :  { %159 = vrsqrt.f32 %v35_v12 }
 0x134   :  { %v160_v13 = vpop.eup %159 }
 0x135   :  { %v37_v15 = vmul.f32 %v160_v13, %v29_v4 }
 0x137   :  { %v45_v17 = vmul.f32 %v137_v14, %v37_v15 }
 0x139   :  { %v53_v18 = vadd.f32 %v138_v16, %v45_v17 }
 0x13b   :  { %v54_v19 = vpack.c.bf16 %v53_v18, %v53_v18 }
 0x13d   :  { %151 = vmatmul.mubr.msk.bf16.vlgmr.msra.gmra.mrb[0].mxu0 %vm78_vm2, %v54_v19 }
 0x210   :  { %v116_v21 = vpop.f32.mrb[0].mxu0 }
 0x211   :  { %v117_v22 = vadd.f32 %v139_v20, %v116_v21  ;;  %v152_v23 = vpop.f32.mrb[1].mxu0 }
 0x212   :  { %v119_v24 = vpop.f32.mrb[2].mxu0 }
 0x213   :  { %122 = vst.msk [vmem:[#allocation2] sm:$0x3] %vm23_vm0, %v117_v22  ;;  %v153_v25 = vpop.f32.mrb[3].mxu0 }
 0x214   :  { %172 = shalt.err (!%p169_p4)
}
 0x215   :  { %s173_s2 = scalar_lea.hbm %s256_s5, 32 }
 0x216   :  { %p174_p5 = scmp.ne.s32.totalorder %s256_s5, %s173_s2  ;;  %p177_p6 = scmp.lt.u32.totalorder %s173_s2, %s256_s5 }
 0x218   :  { %p179_p7 = pnand %p177_p6, %p174_p5 }
 0x21a   :  { %182 = shalt.err (!%p179_p7)
}
 0x21b   :  { %132 = dma.vmem_to_hbm [thread:$0]  %s130_s29, 32, %s256_s5, [#allocation3]  }
 0x21c   :  { %183 = dma.done.wait [#allocation3], 32  }
 0x21d   :  { %184 = vsyncadd [#allocation3], 4294967264 }
 0x21e   :  { %136 = vsyncpa [#allocation3], 1 }

</bundles_post_ra>
